<compile_context>
chip_gen: v7x
topology: tpu7x:2x2x1
jax: 0.10.0
libtpu: 0.0.40
codegen_flags: <defaults>
</compile_context>

<pallas_src>
import functools
import math

import jax
import jax.numpy as jnp
from jax import lax
from jax.experimental import pallas as pl
from jax.experimental.pallas import tpu as pltpu

# 2-D dot_general dimension numbers ("N" = as-is, "T" = contract on trailing dim).
NN_DIMS = (((1,), (0,)), ((), ()))   # A[m,k] @ B[k,n]
NT_DIMS = (((1,), (1,)), ((), ()))   # A[m,k] @ B[n,k]^T


def gat_kernel(node_ref, edge_ref, maskb_ref,
               wq_ref, bq_ref, wkv_ref, bkv_ref,
               we_ref, be_ref, wo_ref, bo_ref,
               out_ref, kv_ref, ho_ref,
               *, num_heads, head_dim, out_features, edge_dim, q_tile,
               compute_dtype, exp_dtype):
    H, D, F, E, TQ = num_heads, head_dim, out_features, edge_dim, q_tile
    cd = compute_dtype
    f32 = jnp.float32
    qi = pl.program_id(1)

    # ---- once per batch element: fused K|V projection -> persistent VMEM ----
    @pl.when(qi == 0)
    def _():
        x_all = node_ref[0]                                       # [N, F_in]
        kv = lax.dot_general(wkv_ref[...], x_all, NT_DIMS,
                             preferred_element_type=f32)          # [2F, N] feature-major
        kv_ref[...] = (kv + bkv_ref[...]).astype(kv_ref.dtype)

    # ---- per query tile ----
    row0 = pl.multiple_of(qi * TQ, TQ)
    x_q = node_ref[0, pl.ds(row0, TQ), :]                         # [TQ, F_in] (no 2nd input stream)
    q = lax.dot_general(x_q, wq_ref[...], NT_DIMS,
                        preferred_element_type=f32) + bq_ref[...]  # [TQ, F], 1/sqrt(D) pre-folded
    q = q.astype(cd)                                               # cast once, not per head

    mask_bias = maskb_ref[0].astype(f32)                           # [TQ, N] additive 0 / -1e30
    # E is small: load/cast each edge plane once, reuse it for every head.
    edge_f32 = [edge_ref[0, e].astype(f32) for e in range(E)]

    for h in range(H):                                             # static unroll over heads
        q_h = q[:, h * D:(h + 1) * D]                              # [TQ, D]
        k_h = kv_ref[h * D:(h + 1) * D, :]                         # [D, N] (sublane slice of scratch)
        v_h = kv_ref[F + h * D:F + (h + 1) * D, :]                 # [D, N]

        s = lax.dot_general(q_h, k_h, NN_DIMS,
                            preferred_element_type=f32)            # [TQ, N]

        # Edge bias: VPU scalar-broadcast FMA (no MXU matmul, no reshape relayout).
        bias = mask_bias + be_ref[h]
        for e in range(E):
            bias = bias + we_ref[h, e] * edge_f32[e]
        s = s + bias

        # Numerically stable softmax; 1/denominator folded into the P@V output.
        s_max = jnp.max(s, axis=-1, keepdims=True)
        p = jnp.exp((s - s_max).astype(exp_dtype))                 # bf16 exponent on v6e/v7x
        denom = jnp.sum(p.astype(f32), axis=-1, keepdims=True)     # f32 accumulation
        inv_denom = pl.reciprocal(denom, approx=True)              # EUP slot
        # TODO(synk): attention-weight dropout omitted (inference semantics).

        pv = lax.dot_general(p.astype(cd), v_h, NT_DIMS,
                             preferred_element_type=f32)           # [TQ, D]
        ho_ref[:, h * D:(h + 1) * D] = pv * inv_denom              # slab write at lane offset h*D

    # Fused output projection: one [TQ,F]@[F,F] matmul instead of H K=D matmuls.
    out = lax.dot_general(ho_ref[...].astype(cd), wo_ref[...], NN_DIMS,
                          preferred_element_type=f32) + bo_ref[...]
    out_ref[0] = out.astype(out_ref.dtype)


def _vmem_capacity_bytes():
    try:
        return int(pltpu.get_tpu_info().vmem_capacity_bytes)
    except Exception:
        return 64 << 20        # v7x-safe fallback


def _device_kind():
    try:
        return jax.devices()[0].device_kind.lower()
    except Exception:
        return ""


def graph_attention_forward(node, edge, mask, params, num_heads, *,
                            q_tile=None, compute_dtype=jnp.bfloat16,
                            exp_in_bf16=None):
    B, N, F_in = node.shape
    E = edge.shape[-1]
    F_out = params["wq"].shape[0]
    assert F_out % num_heads == 0
    D = F_out // num_heads
    # Default query tile: as large as possible (keeps the MXU M-dimension busy
    # and amortizes per-grid-step overhead).  Callers with very large N should
    # pass a 128-multiple that fits the VMEM budget computed below.
    TQ = N if q_tile is None else q_tile
    assert N % TQ == 0 and (TQ == N or TQ % 8 == 0)
    QT = N // TQ
    cd = jnp.dtype(compute_dtype)
    scale = 1.0 / math.sqrt(D)

    # bf16 exponent only where the EUP has bf16 throughput (v6e / v7x); f32 on v5e.
    if exp_in_bf16 is None:
        dk = _device_kind()
        exp_in_bf16 = (cd == jnp.dtype(jnp.bfloat16)) and any(
            t in dk for t in ("v6", "v7", "tpu7"))
    exp_dtype = jnp.bfloat16 if exp_in_bf16 else jnp.float32

    # ---- one-time wrapper-side parameter prep (outside the kernel) ----
    wq = (params["wq"] * scale).astype(cd)                         # [F, F_in]  (1/sqrt(D) folded)
    bq = (params["bq"] * scale).astype(jnp.float32)                # [1, F]
    wkv = jnp.concatenate([params["wk"], params["wv"]], axis=0).astype(cd)    # [2F, F_in]
    bkv = jnp.concatenate([params["bk"], params["bv"]],
                          axis=1).reshape(2 * F_out, 1).astype(jnp.float32)   # [2F, 1]
    we = params["we"].astype(jnp.float32)                          # [H, E]  (SMEM scalars)
    be = params["be"].reshape(num_heads).astype(jnp.float32)       # [H]     (SMEM scalars)
    wo = params["wo"].T.astype(cd)                                 # [F, F]  ([in, out])
    bo = params["bo"].astype(jnp.float32)                          # [1, F]

    # Lane-dense edge layout: [B,N,N,E] -> [B,E,N,N] (last dim = N full lanes).
    # TODO(synk): this transpose is a full HBM read+write of the largest tensor;
    # cache it across calls / have the producer emit [B,E,N,N] directly.
    edge_t = jnp.transpose(edge, (0, 3, 1, 2)).astype(cd)
    node_c = node.astype(cd)
    # Additive mask bias precomputed once in the compute dtype (2x less HBM
    # traffic than an f32 mask; finite -1e30 so fully-masked rows degrade to
    # uniform attention instead of NaN).
    mask_bias = jnp.where(mask != 0.0, 0.0, -1e30).astype(cd)

    def wspec(shape):
        return pl.BlockSpec(shape, lambda b, qi: (0,) * len(shape))

    smem = pl.BlockSpec(memory_space=pltpu.MemorySpace.SMEM)

    in_specs = [
        pl.BlockSpec((1, N, F_in), lambda b, qi: (b, 0, 0)),       # node: all rows (re-DMA only when b changes)
        pl.BlockSpec((1, E, TQ, N), lambda b, qi: (b, 0, qi, 0)),  # edge planes for this query tile
        pl.BlockSpec((1, TQ, N), lambda b, qi: (b, qi, 0)),        # additive mask bias tile
        wspec((F_out, F_in)), wspec((1, F_out)),                   # Wq (scaled), bq
        wspec((2 * F_out, F_in)), wspec((2 * F_out, 1)),           # fused Wk|Wv, bk|bv
        smem, smem,                                                # edge_proj weight / bias (scalars)
        wspec((F_out, F_out)), wspec((1, F_out)),                  # out_proj (pre-transposed), bo
    ]
    # NOTE: when F_out < 128 this output is a masked partial store; a lane-dense
    # [B, QT, TQ*F_out] layout avoids that but needs an in-kernel collapse
    # relayout, so it is left to callers with F_out >= 128 (already lane-dense).
    out_spec = pl.BlockSpec((1, TQ, F_out), lambda b, qi: (b, qi, 0))

    # ---- generation-aware VMEM budget (tiles + scratch + in-kernel temps) ----
    cdb = cd.itemsize
    io_bytes = 2 * (N * F_in * cdb + E * TQ * N * cdb + TQ * N * cdb
                    + TQ * F_out * 4)
    w_bytes = 2 * (F_out * F_in * cdb + 2 * F_out * F_in * cdb
                   + F_out * F_out * cdb + 4 * (5 * F_out))
    scratch_bytes = 2 * F_out * N * cdb + TQ * F_out * 4
    temp_bytes = 4 * (TQ * F_out + 2 * F_out * N + E * TQ * N + 4 * TQ * N)
    needed = io_bytes + w_bytes + scratch_bytes + temp_bytes
    usable = int(0.85 * _vmem_capacity_bytes())                    # 64 MiB physical on v7x
    vmem_limit = int(min(usable, max(32 << 20, needed + (8 << 20))))

    kernel = functools.partial(
        gat_kernel, num_heads=num_heads, head_dim=D, out_features=F_out,
        edge_dim=E, q_tile=TQ, compute_dtype=cd, exp_dtype=exp_dtype)

    return pl.pallas_call(
        kernel,
        out_shape=jax.ShapeDtypeStruct((B, N, F_out), jnp.float32),
        grid_spec=pltpu.PrefetchScalarGridSpec(
            num_scalar_prefetch=0,
            grid=(B, QT),
            in_specs=in_specs,
            out_specs=out_spec,
            scratch_shapes=[
                pltpu.VMEM((2 * F_out, N), cd),         # persistent K|V projection (per batch)
                pltpu.VMEM((TQ, F_out), jnp.float32),   # per-head output slab (fused out-proj)
            ],
        ),
        compiler_params=pltpu.CompilerParams(
            # batch axis "parallel" (megacore shards b); query-tile axis
            # "arbitrary" because the K/V scratch carries across it.
            dimension_semantics=("parallel", "arbitrary"),
            vmem_limit_bytes=vmem_limit,
        ),
    )(node_c, edge_t, mask_bias, wq, bq, wkv, bkv, we, be, wo, bo)


def reference_forward(node, edge, mask, params, num_heads):
    """Pure-JAX mirror of the PyTorch forward, for validation."""
    B, N, _ = node.shape
    F_out = params["wq"].shape[0]
    D = F_out // num_heads

    def lin(x, w, b):
        return jnp.einsum("...i,oi->...o", x, w) + b[0]

    q = lin(node, params["wq"], params["bq"]).reshape(B, N, num_heads, D).transpose(0, 2, 1, 3)
    k = lin(node, params["wk"], params["bk"]).reshape(B, N, num_heads, D).transpose(0, 2, 1, 3)
    v = lin(node, params["wv"], params["bv"]).reshape(B, N, num_heads, D).transpose(0, 2, 1, 3)
    scores = jnp.einsum("bhnd,bhmd->bhnm", q, k) / math.sqrt(D)
    eb = lin(edge, params["we"], params["be"]).transpose(0, 3, 1, 2)
    scores = scores + eb
    scores = jnp.where(mask[:, None, :, :] == 0.0, -jnp.inf, scores)
    attn = jax.nn.softmax(scores, axis=-1)
    out = jnp.einsum("bhnm,bhmd->bhnd", attn, v)
    out = out.transpose(0, 2, 1, 3).reshape(B, N, F_out)
    return lin(out, params["wo"], params["bo"])


def xavier_uniform(key, shape):
    fan_out, fan_in = shape
    limit = math.sqrt(6.0 / (fan_in + fan_out))
    return jax.random.uniform(key, shape, jnp.float32, -limit, limit)


if __name__ == "__main__":
    # Small, module-consistent shapes (head_dim = 16).
    B, N = 2, 16
    in_features, out_features, edge_feat, num_heads = 16, 64, 4, 4

    key = jax.random.PRNGKey(0)
    ks = jax.random.split(key, 16)

    params = {
        "wq": xavier_uniform(ks[0], (out_features, in_features)),
        "bq": 0.1 * jax.random.normal(ks[1], (1, out_features), jnp.float32),
        "wk": xavier_uniform(ks[2], (out_features, in_features)),
        "bk": 0.1 * jax.random.normal(ks[3], (1, out_features), jnp.float32),
        "wv": xavier_uniform(ks[4], (out_features, in_features)),
        "bv": 0.1 * jax.random.normal(ks[5], (1, out_features), jnp.float32),
        "we": xavier_uniform(ks[6], (num_heads, edge_feat)),
        "be": 0.1 * jax.random.normal(ks[7], (1, num_heads), jnp.float32),
        "wo": xavier_uniform(ks[8], (out_features, out_features)),
        "bo": 0.1 * jax.random.normal(ks[9], (1, out_features), jnp.float32),
    }

    node = jax.random.normal(ks[10], (B, N, in_features), jnp.float32)
    edge = jax.random.normal(ks[11], (B, N, N, edge_feat), jnp.float32)
    # Mask with some zeros; keep the diagonal so each row has a valid entry.
    mask = (jax.random.uniform(ks[12], (B, N, N)) > 0.3).astype(jnp.float32)
    mask = jnp.maximum(mask, jnp.eye(N, dtype=jnp.float32)[None])

    ref = reference_forward(node, edge, mask, params, num_heads)

    # 1) f32 operands, single query tile (grid = (B, 1)) — accuracy check.
    out_f32 = graph_attention_forward(node, edge, mask, params, num_heads,
                                      q_tile=None, compute_dtype=jnp.float32)
    out_f32 = jax.block_until_ready(out_f32)
    assert out_f32.shape == (B, N, out_features)
    assert jnp.allclose(out_f32, ref, rtol=2e-2, atol=2e-2), "f32 kernel mismatch vs reference"

    # 2) bf16 operands + query-row tiling (grid = (B, 2)) — exercises the
    #    per-batch K/V scratch reuse across query tiles.
    out_bf16 = graph_attention_forward(node, edge, mask, params, num_heads,
                                       q_tile=8, compute_dtype=jnp.bfloat16)
    out_bf16 = jax.block_until_ready(out_bf16)
    assert out_bf16.shape == (B, N, out_features)
    assert jnp.allclose(out_bf16, ref, rtol=1e-1, atol=1e-1), "bf16 kernel mismatch vs reference"

    print("KERNEL_OK")
</pallas_src>

<mosaic_0001>
module attributes {stable_mosaic.version = 11 : i64} {
  func.func @gat_kernel(%arg0: i32, %arg1: i32, %arg2: memref<1x16x16xf32, #tpu.memory_space<vmem>>, %arg3: memref<1x4x16x16xf32, #tpu.memory_space<vmem>>, %arg4: memref<1x16x16xf32, #tpu.memory_space<vmem>>, %arg5: memref<64x16xf32, #tpu.memory_space<vmem>>, %arg6: memref<1x64xf32, #tpu.memory_space<vmem>>, %arg7: memref<128x16xf32, #tpu.memory_space<vmem>>, %arg8: memref<128x1xf32, #tpu.memory_space<vmem>>, %arg9: memref<4x4xf32, #tpu.memory_space<smem>>, %arg10: memref<4xf32, #tpu.memory_space<smem>>, %arg11: memref<64x64xf32, #tpu.memory_space<vmem>>, %arg12: memref<1x64xf32, #tpu.memory_space<vmem>>, %arg13: memref<1x16x64xf32, #tpu.memory_space<vmem>>, %arg14: memref<128x16xf32, #tpu.memory_space<vmem>>, %arg15: memref<16x64xf32, #tpu.memory_space<vmem>>) attributes {dimension_semantics = [#tpu.dimension_semantics<parallel>, #tpu.dimension_semantics<arbitrary>], iteration_bounds = array<i64: 2, 1>, scalar_prefetch = 0 : i64, scratch_operands = 2 : i64, tpu.core_type = #tpu.core_type<tc>, window_params = [{transform_indices = @transform_0, window_bounds = array<i64: 1, 16, 16>}, {transform_indices = @transform_1, window_bounds = array<i64: 1, 4, 16, 16>}, {transform_indices = @transform_2, window_bounds = array<i64: 1, 16, 16>}, {pipeline_mode = #tpu.pipeline_mode<synchronous>, transform_indices = @transform_3, window_bounds = array<i64: 64, 16>}, {pipeline_mode = #tpu.pipeline_mode<synchronous>, transform_indices = @transform_4, window_bounds = array<i64: 1, 64>}, {pipeline_mode = #tpu.pipeline_mode<synchronous>, transform_indices = @transform_5, window_bounds = array<i64: 128, 16>}, {pipeline_mode = #tpu.pipeline_mode<synchronous>, transform_indices = @transform_6, window_bounds = array<i64: 128, 1>}, {transform_indices = @transform_7, window_bounds = array<i64: 4, 4>}, {transform_indices = @transform_8, window_bounds = array<i64: 4>}, {pipeline_mode = #tpu.pipeline_mode<synchronous>, transform_indices = @transform_9, window_bounds = array<i64: 64, 64>}, {pipeline_mode = #tpu.pipeline_mode<synchronous>, transform_indices = @transform_10, window_bounds = array<i64: 1, 64>}, {transform_indices = @transform_11, window_bounds = array<i64: 1, 16, 64>}]} {
    %c0_i32 = arith.constant 0 : i32
    %0 = arith.cmpi eq, %arg1, %c0_i32 : i32
    %1 = arith.extui %0 : i1 to i32
    %c0_i32_0 = arith.constant 0 : i32
    %2 = arith.cmpi ne, %1, %c0_i32_0 : i32
    scf.if %2 {
      %c0_101 = arith.constant 0 : index
      %c0_102 = arith.constant 0 : index
      %c0_103 = arith.constant 0 : index
      %176 = vector.load %arg2[%c0_101, %c0_102, %c0_103] : memref<1x16x16xf32, #tpu.memory_space<vmem>>, vector<1x16x16xf32>
      %177 = vector.shape_cast %176 : vector<1x16x16xf32> to vector<16x16xf32>
      %c0_104 = arith.constant 0 : index
      %c0_105 = arith.constant 0 : index
      %178 = vector.load %arg7[%c0_104, %c0_105] : memref<128x16xf32, #tpu.memory_space<vmem>>, vector<128x16xf32>
      %cst_106 = arith.constant dense<0.000000e+00> : vector<128x16xf32>
      %179 = tpu.matmul %178, %177, %cst_106 {dimension_numbers = #tpu.dot_dimension_numbers<[1], [1], [0], [0], [0, 0, 1, 0], [], []>} : vector<128x16xf32>, vector<16x16xf32>, vector<128x16xf32> -> vector<128x16xf32>
      %c0_107 = arith.constant 0 : index
      %c0_108 = arith.constant 0 : index
      %180 = vector.load %arg8[%c0_107, %c0_108] : memref<128x1xf32, #tpu.memory_space<vmem>>, vector<128x1xf32>
      %181 = vector.broadcast %180 : vector<128x1xf32> to vector<128x16xf32>
      %182 = arith.addf %179, %181 : vector<128x16xf32>
      %c0_109 = arith.constant 0 : index
      %c0_110 = arith.constant 0 : index
      %183 = vector.load %arg14[%c0_109, %c0_110] : memref<128x16xf32, #tpu.memory_space<vmem>>, vector<128x16xf32>
      tpu.vector_store %arg14[%c0_109, %c0_110], %182 {strides = array<i32>} : memref<128x16xf32, #tpu.memory_space<vmem>>, vector<128x16xf32>,
    } else {
    }
    %c16_i32 = arith.constant 16 : i32
    %3 = arith.muli %arg1, %c16_i32 : i32
    %4 = tpu.assume_multiple %3, 16 : i32
    %c0 = arith.constant 0 : index
    %5 = arith.index_cast %4 : i32 to index
    %c0_1 = arith.constant 0 : index
    %6 = vector.load %arg2[%c0, %5, %c0_1] : memref<1x16x16xf32, #tpu.memory_space<vmem>>, vector<1x16x16xf32>
    %7 = vector.shape_cast %6 : vector<1x16x16xf32> to vector<16x16xf32>
    %c0_2 = arith.constant 0 : index
    %c0_3 = arith.constant 0 : index
    %8 = vector.load %arg5[%c0_2, %c0_3] : memref<64x16xf32, #tpu.memory_space<vmem>>, vector<64x16xf32>
    %cst = arith.constant dense<0.000000e+00> : vector<16x64xf32>
    %9 = tpu.matmul %7, %8, %cst {dimension_numbers = #tpu.dot_dimension_numbers<[1], [1], [0], [0], [0, 0, 1, 0], [], []>} : vector<16x16xf32>, vector<64x16xf32>, vector<16x64xf32> -> vector<16x64xf32>
    %c0_4 = arith.constant 0 : index
    %c0_5 = arith.constant 0 : index
    %10 = vector.load %arg6[%c0_4, %c0_5] : memref<1x64xf32, #tpu.memory_space<vmem>>, vector<1x64xf32>
    %11 = vector.broadcast %10 : vector<1x64xf32> to vector<16x64xf32>
    %12 = arith.addf %9, %11 : vector<16x64xf32>
    %c0_6 = arith.constant 0 : index
    %c0_7 = arith.constant 0 : index
    %c0_8 = arith.constant 0 : index
    %13 = vector.load %arg4[%c0_6, %c0_7, %c0_8] : memref<1x16x16xf32, #tpu.memory_space<vmem>>, vector<1x16x16xf32>
    %14 = vector.shape_cast %13 : vector<1x16x16xf32> to vector<16x16xf32>
    %c0_9 = arith.constant 0 : index
    %c0_10 = arith.constant 0 : index
    %c0_11 = arith.constant 0 : index
    %c0_12 = arith.constant 0 : index
    %15 = vector.load %arg3[%c0_9, %c0_10, %c0_11, %c0_12] : memref<1x4x16x16xf32, #tpu.memory_space<vmem>>, vector<1x1x16x16xf32>
    %16 = vector.shape_cast %15 : vector<1x1x16x16xf32> to vector<16x16xf32>
    %c0_13 = arith.constant 0 : index
    %c1 = arith.constant 1 : index
    %c0_14 = arith.constant 0 : index
    %c0_15 = arith.constant 0 : index
    %17 = vector.load %arg3[%c0_13, %c1, %c0_14, %c0_15] : memref<1x4x16x16xf32, #tpu.memory_space<vmem>>, vector<1x1x16x16xf32>
    %18 = vector.shape_cast %17 : vector<1x1x16x16xf32> to vector<16x16xf32>
    %c0_16 = arith.constant 0 : index
    %c2 = arith.constant 2 : index
    %c0_17 = arith.constant 0 : index
    %c0_18 = arith.constant 0 : index
    %19 = vector.load %arg3[%c0_16, %c2, %c0_17, %c0_18] : memref<1x4x16x16xf32, #tpu.memory_space<vmem>>, vector<1x1x16x16xf32>
    %20 = vector.shape_cast %19 : vector<1x1x16x16xf32> to vector<16x16xf32>
    %c0_19 = arith.constant 0 : index
    %c3 = arith.constant 3 : index
    %c0_20 = arith.constant 0 : index
    %c0_21 = arith.constant 0 : index
    %21 = vector.load %arg3[%c0_19, %c3, %c0_20, %c0_21] : memref<1x4x16x16xf32, #tpu.memory_space<vmem>>, vector<1x1x16x16xf32>
    %22 = vector.shape_cast %21 : vector<1x1x16x16xf32> to vector<16x16xf32>
    %23 = vector.extract_strided_slice %12 {offsets = [0, 0], sizes = [16, 16], strides = [1, 1]} : vector<16x64xf32> to vector<16x16xf32>
    %c0_22 = arith.constant 0 : index
    %c0_23 = arith.constant 0 : index
    %24 = vector.load %arg14[%c0_22, %c0_23] : memref<128x16xf32, #tpu.memory_space<vmem>>, vector<16x16xf32>
    %c64 = arith.constant 64 : index
    %c0_24 = arith.constant 0 : index
    %25 = vector.load %arg14[%c64, %c0_24] : memref<128x16xf32, #tpu.memory_space<vmem>>, vector<16x16xf32>
    %cst_25 = arith.constant dense<0.000000e+00> : vector<16x16xf32>
    %26 = tpu.matmul %23, %24, %cst_25 {dimension_numbers = #tpu.dot_dimension_numbers<[1], [0], [0], [1], [0, 0, 1, 1], [], []>} : vector<16x16xf32>, vector<16x16xf32>, vector<16x16xf32> -> vector<16x16xf32>
    %c0_26 = arith.constant 0 : index
    %27 = memref.load %arg10[%c0_26] : memref<4xf32, #tpu.memory_space<smem>>
    %28 = vector.broadcast %27 : f32 to vector<16x16xf32>
    %29 = arith.addf %14, %28 : vector<16x16xf32>
    %c0_27 = arith.constant 0 : index
    %c0_28 = arith.constant 0 : index
    %30 = memref.load %arg9[%c0_27, %c0_28] : memref<4x4xf32, #tpu.memory_space<smem>>
    %31 = vector.broadcast %30 : f32 to vector<16x16xf32>
    %32 = arith.mulf %31, %16 : vector<16x16xf32>
    %33 = arith.addf %29, %32 : vector<16x16xf32>
    %c0_29 = arith.constant 0 : index
    %c1_30 = arith.constant 1 : index
    %34 = memref.load %arg9[%c0_29, %c1_30] : memref<4x4xf32, #tpu.memory_space<smem>>
    %35 = vector.broadcast %34 : f32 to vector<16x16xf32>
    %36 = arith.mulf %35, %18 : vector<16x16xf32>
    %37 = arith.addf %33, %36 : vector<16x16xf32>
    %c0_31 = arith.constant 0 : index
    %c2_32 = arith.constant 2 : index
    %38 = memref.load %arg9[%c0_31, %c2_32] : memref<4x4xf32, #tpu.memory_space<smem>>
    %39 = vector.broadcast %38 : f32 to vector<16x16xf32>
    %40 = arith.mulf %39, %20 : vector<16x16xf32>
    %41 = arith.addf %37, %40 : vector<16x16xf32>
    %c0_33 = arith.constant 0 : index
    %c3_34 = arith.constant 3 : index
    %42 = memref.load %arg9[%c0_33, %c3_34] : memref<4x4xf32, #tpu.memory_space<smem>>
    %43 = vector.broadcast %42 : f32 to vector<16x16xf32>
    %44 = arith.mulf %43, %22 : vector<16x16xf32>
    %45 = arith.addf %41, %44 : vector<16x16xf32>
    %46 = arith.addf %26, %45 : vector<16x16xf32>
    %cst_35 = arith.constant dense<0xFF800000> : vector<16xf32>
    %47 = vector.multi_reduction <maximumf>, %46, %cst_35 [1] : vector<16x16xf32> to vector<16xf32>
    %48 = vector.shape_cast %47 : vector<16xf32> to vector<16x1xf32>
    %49 = vector.broadcast %48 : vector<16x1xf32> to vector<16x16xf32>
    %50 = arith.subf %46, %49 : vector<16x16xf32>
    %51 = math.exp %50 : vector<16x16xf32>
    %cst_36 = arith.constant dense<0.000000e+00> : vector<16xf32>
    %52 = vector.multi_reduction <add>, %51, %cst_36 [1] : vector<16x16xf32> to vector<16xf32>
    %53 = vector.shape_cast %52 : vector<16xf32> to vector<16x1xf32>
    %54 = tpu.reciprocal %53 {approx = true} : vector<16x1xf32> -> vector<16x1xf32>
    %cst_37 = arith.constant dense<0.000000e+00> : vector<16x16xf32>
    %55 = tpu.matmul %51, %25, %cst_37 {dimension_numbers = #tpu.dot_dimension_numbers<[1], [1], [0], [0], [0, 0, 1, 0], [], []>} : vector<16x16xf32>, vector<16x16xf32>, vector<16x16xf32> -> vector<16x16xf32>
    %56 = vector.broadcast %54 : vector<16x1xf32> to vector<16x16xf32>
    %57 = arith.mulf %55, %56 : vector<16x16xf32>
    %c0_38 = arith.constant 0 : index
    %c0_39 = arith.constant 0 : index
    %58 = vector.load %arg15[%c0_38, %c0_39] : memref<16x64xf32, #tpu.memory_space<vmem>>, vector<16x16xf32>
    tpu.vector_store %arg15[%c0_38, %c0_39], %57 {strides = array<i32>} : memref<16x64xf32, #tpu.memory_space<vmem>>, vector<16x16xf32>,
    %59 = vector.extract_strided_slice %12 {offsets = [0, 16], sizes = [16, 16], strides = [1, 1]} : vector<16x64xf32> to vector<16x16xf32>
    %c16 = arith.constant 16 : index
    %c0_40 = arith.constant 0 : index
    %60 = vector.load %arg14[%c16, %c0_40] : memref<128x16xf32, #tpu.memory_space<vmem>>, vector<16x16xf32>
    %c80 = arith.constant 80 : index
    %c0_41 = arith.constant 0 : index
    %61 = vector.load %arg14[%c80, %c0_41] : memref<128x16xf32, #tpu.memory_space<vmem>>, vector<16x16xf32>
    %cst_42 = arith.constant dense<0.000000e+00> : vector<16x16xf32>
    %62 = tpu.matmul %59, %60, %cst_42 {dimension_numbers = #tpu.dot_dimension_numbers<[1], [0], [0], [1], [0, 0, 1, 1], [], []>} : vector<16x16xf32>, vector<16x16xf32>, vector<16x16xf32> -> vector<16x16xf32>
    %c1_43 = arith.constant 1 : index
    %63 = memref.load %arg10[%c1_43] : memref<4xf32, #tpu.memory_space<smem>>
    %64 = vector.broadcast %63 : f32 to vector<16x16xf32>
    %65 = arith.addf %14, %64 : vector<16x16xf32>
    %c1_44 = arith.constant 1 : index
    %c0_45 = arith.constant 0 : index
    %66 = memref.load %arg9[%c1_44, %c0_45] : memref<4x4xf32, #tpu.memory_space<smem>>
    %67 = vector.broadcast %66 : f32 to vector<16x16xf32>
    %68 = arith.mulf %67, %16 : vector<16x16xf32>
    %69 = arith.addf %65, %68 : vector<16x16xf32>
    %c1_46 = arith.constant 1 : index
    %c1_47 = arith.constant 1 : index
    %70 = memref.load %arg9[%c1_46, %c1_47] : memref<4x4xf32, #tpu.memory_space<smem>>
    %71 = vector.broadcast %70 : f32 to vector<16x16xf32>
    %72 = arith.mulf %71, %18 : vector<16x16xf32>
    %73 = arith.addf %69, %72 : vector<16x16xf32>
    %c1_48 = arith.constant 1 : index
    %c2_49 = arith.constant 2 : index
    %74 = memref.load %arg9[%c1_48, %c2_49] : memref<4x4xf32, #tpu.memory_space<smem>>
    %75 = vector.broadcast %74 : f32 to vector<16x16xf32>
    %76 = arith.mulf %75, %20 : vector<16x16xf32>
    %77 = arith.addf %73, %76 : vector<16x16xf32>
    %c1_50 = arith.constant 1 : index
    %c3_51 = arith.constant 3 : index
    %78 = memref.load %arg9[%c1_50, %c3_51] : memref<4x4xf32, #tpu.memory_space<smem>>
    %79 = vector.broadcast %78 : f32 to vector<16x16xf32>
    %80 = arith.mulf %79, %22 : vector<16x16xf32>
    %81 = arith.addf %77, %80 : vector<16x16xf32>
    %82 = arith.addf %62, %81 : vector<16x16xf32>
    %cst_52 = arith.constant dense<0xFF800000> : vector<16xf32>
    %83 = vector.multi_reduction <maximumf>, %82, %cst_52 [1] : vector<16x16xf32> to vector<16xf32>
    %84 = vector.shape_cast %83 : vector<16xf32> to vector<16x1xf32>
    %85 = vector.broadcast %84 : vector<16x1xf32> to vector<16x16xf32>
    %86 = arith.subf %82, %85 : vector<16x16xf32>
    %87 = math.exp %86 : vector<16x16xf32>
    %cst_53 = arith.constant dense<0.000000e+00> : vector<16xf32>
    %88 = vector.multi_reduction <add>, %87, %cst_53 [1] : vector<16x16xf32> to vector<16xf32>
    %89 = vector.shape_cast %88 : vector<16xf32> to vector<16x1xf32>
    %90 = tpu.reciprocal %89 {approx = true} : vector<16x1xf32> -> vector<16x1xf32>
    %cst_54 = arith.constant dense<0.000000e+00> : vector<16x16xf32>
    %91 = tpu.matmul %87, %61, %cst_54 {dimension_numbers = #tpu.dot_dimension_numbers<[1], [1], [0], [0], [0, 0, 1, 0], [], []>} : vector<16x16xf32>, vector<16x16xf32>, vector<16x16xf32> -> vector<16x16xf32>
    %92 = vector.broadcast %90 : vector<16x1xf32> to vector<16x16xf32>
    %93 = arith.mulf %91, %92 : vector<16x16xf32>
    %c0_55 = arith.constant 0 : index
    %c16_56 = arith.constant 16 : index
    %94 = vector.load %arg15[%c0_55, %c16_56] : memref<16x64xf32, #tpu.memory_space<vmem>>, vector<16x16xf32>
    tpu.vector_store %arg15[%c0_55, %c16_56], %93 {strides = array<i32>} : memref<16x64xf32, #tpu.memory_space<vmem>>, vector<16x16xf32>,
    %95 = vector.extract_strided_slice %12 {offsets = [0, 32], sizes = [16, 16], strides = [1, 1]} : vector<16x64xf32> to vector<16x16xf32>
    %c32 = arith.constant 32 : index
    %c0_57 = arith.constant 0 : index
    %96 = vector.load %arg14[%c32, %c0_57] : memref<128x16xf32, #tpu.memory_space<vmem>>, vector<16x16xf32>
    %c96 = arith.constant 96 : index
    %c0_58 = arith.constant 0 : index
    %97 = vector.load %arg14[%c96, %c0_58] : memref<128x16xf32, #tpu.memory_space<vmem>>, vector<16x16xf32>
    %cst_59 = arith.constant dense<0.000000e+00> : vector<16x16xf32>
    %98 = tpu.matmul %95, %96, %cst_59 {dimension_numbers = #tpu.dot_dimension_numbers<[1], [0], [0], [1], [0, 0, 1, 1], [], []>} : vector<16x16xf32>, vector<16x16xf32>, vector<16x16xf32> -> vector<16x16xf32>
    %c2_60 = arith.constant 2 : index
    %99 = memref.load %arg10[%c2_60] : memref<4xf32, #tpu.memory_space<smem>>
    %100 = vector.broadcast %99 : f32 to vector<16x16xf32>
    %101 = arith.addf %14, %100 : vector<16x16xf32>
    %c2_61 = arith.constant 2 : index
    %c0_62 = arith.constant 0 : index
    %102 = memref.load %arg9[%c2_61, %c0_62] : memref<4x4xf32, #tpu.memory_space<smem>>
    %103 = vector.broadcast %102 : f32 to vector<16x16xf32>
    %104 = arith.mulf %103, %16 : vector<16x16xf32>
    %105 = arith.addf %101, %104 : vector<16x16xf32>
    %c2_63 = arith.constant 2 : index
    %c1_64 = arith.constant 1 : index
    %106 = memref.load %arg9[%c2_63, %c1_64] : memref<4x4xf32, #tpu.memory_space<smem>>
    %107 = vector.broadcast %106 : f32 to vector<16x16xf32>
    %108 = arith.mulf %107, %18 : vector<16x16xf32>
    %109 = arith.addf %105, %108 : vector<16x16xf32>
    %c2_65 = arith.constant 2 : index
    %c2_66 = arith.constant 2 : index
    %110 = memref.load %arg9[%c2_65, %c2_66] : memref<4x4xf32, #tpu.memory_space<smem>>
    %111 = vector.broadcast %110 : f32 to vector<16x16xf32>
    %112 = arith.mulf %111, %20 : vector<16x16xf32>
    %113 = arith.addf %109, %112 : vector<16x16xf32>
    %c2_67 = arith.constant 2 : index
    %c3_68 = arith.constant 3 : index
    %114 = memref.load %arg9[%c2_67, %c3_68] : memref<4x4xf32, #tpu.memory_space<smem>>
    %115 = vector.broadcast %114 : f32 to vector<16x16xf32>
    %116 = arith.mulf %115, %22 : vector<16x16xf32>
    %117 = arith.addf %113, %116 : vector<16x16xf32>
    %118 = arith.addf %98, %117 : vector<16x16xf32>
    %cst_69 = arith.constant dense<0xFF800000> : vector<16xf32>
    %119 = vector.multi_reduction <maximumf>, %118, %cst_69 [1] : vector<16x16xf32> to vector<16xf32>
    %120 = vector.shape_cast %119 : vector<16xf32> to vector<16x1xf32>
    %121 = vector.broadcast %120 : vector<16x1xf32> to vector<16x16xf32>
    %122 = arith.subf %118, %121 : vector<16x16xf32>
    %123 = math.exp %122 : vector<16x16xf32>
    %cst_70 = arith.constant dense<0.000000e+00> : vector<16xf32>
    %124 = vector.multi_reduction <add>, %123, %cst_70 [1] : vector<16x16xf32> to vector<16xf32>
    %125 = vector.shape_cast %124 : vector<16xf32> to vector<16x1xf32>
    %126 = tpu.reciprocal %125 {approx = true} : vector<16x1xf32> -> vector<16x1xf32>
    %cst_71 = arith.constant dense<0.000000e+00> : vector<16x16xf32>
    %127 = tpu.matmul %123, %97, %cst_71 {dimension_numbers = #tpu.dot_dimension_numbers<[1], [1], [0], [0], [0, 0, 1, 0], [], []>} : vector<16x16xf32>, vector<16x16xf32>, vector<16x16xf32> -> vector<16x16xf32>
    %128 = vector.broadcast %126 : vector<16x1xf32> to vector<16x16xf32>
    %129 = arith.mulf %127, %128 : vector<16x16xf32>
    %c0_72 = arith.constant 0 : index
    %c32_73 = arith.constant 32 : index
    %130 = vector.load %arg15[%c0_72, %c32_73] : memref<16x64xf32, #tpu.memory_space<vmem>>, vector<16x16xf32>
    tpu.vector_store %arg15[%c0_72, %c32_73], %129 {strides = array<i32>} : memref<16x64xf32, #tpu.memory_space<vmem>>, vector<16x16xf32>,
    %131 = vector.extract_strided_slice %12 {offsets = [0, 48], sizes = [16, 16], strides = [1, 1]} : vector<16x64xf32> to vector<16x16xf32>
    %c48 = arith.constant 48 : index
    %c0_74 = arith.constant 0 : index
    %132 = vector.load %arg14[%c48, %c0_74] : memref<128x16xf32, #tpu.memory_space<vmem>>, vector<16x16xf32>
    %c112 = arith.constant 112 : index
    %c0_75 = arith.constant 0 : index
    %133 = vector.load %arg14[%c112, %c0_75] : memref<128x16xf32, #tpu.memory_space<vmem>>, vector<16x16xf32>
    %cst_76 = arith.constant dense<0.000000e+00> : vector<16x16xf32>
    %134 = tpu.matmul %131, %132, %cst_76 {dimension_numbers = #tpu.dot_dimension_numbers<[1], [0], [0], [1], [0, 0, 1, 1], [], []>} : vector<16x16xf32>, vector<16x16xf32>, vector<16x16xf32> -> vector<16x16xf32>
    %c3_77 = arith.constant 3 : index
    %135 = memref.load %arg10[%c3_77] : memref<4xf32, #tpu.memory_space<smem>>
    %136 = vector.broadcast %135 : f32 to vector<16x16xf32>
    %137 = arith.addf %14, %136 : vector<16x16xf32>
    %c3_78 = arith.constant 3 : index
    %c0_79 = arith.constant 0 : index
    %138 = memref.load %arg9[%c3_78, %c0_79] : memref<4x4xf32, #tpu.memory_space<smem>>
    %139 = vector.broadcast %138 : f32 to vector<16x16xf32>
    %140 = arith.mulf %139, %16 : vector<16x16xf32>
    %141 = arith.addf %137, %140 : vector<16x16xf32>
    %c3_80 = arith.constant 3 : index
    %c1_81 = arith.constant 1 : index
    %142 = memref.load %arg9[%c3_80, %c1_81] : memref<4x4xf32, #tpu.memory_space<smem>>
    %143 = vector.broadcast %142 : f32 to vector<16x16xf32>
    %144 = arith.mulf %143, %18 : vector<16x16xf32>
    %145 = arith.addf %141, %144 : vector<16x16xf32>
    %c3_82 = arith.constant 3 : index
    %c2_83 = arith.constant 2 : index
    %146 = memref.load %arg9[%c3_82, %c2_83] : memref<4x4xf32, #tpu.memory_space<smem>>
    %147 = vector.broadcast %146 : f32 to vector<16x16xf32>
    %148 = arith.mulf %147, %20 : vector<16x16xf32>
    %149 = arith.addf %145, %148 : vector<16x16xf32>
    %c3_84 = arith.constant 3 : index
    %c3_85 = arith.constant 3 : index
    %150 = memref.load %arg9[%c3_84, %c3_85] : memref<4x4xf32, #tpu.memory_space<smem>>
    %151 = vector.broadcast %150 : f32 to vector<16x16xf32>
    %152 = arith.mulf %151, %22 : vector<16x16xf32>
    %153 = arith.addf %149, %152 : vector<16x16xf32>
    %154 = arith.addf %134, %153 : vector<16x16xf32>
    %cst_86 = arith.constant dense<0xFF800000> : vector<16xf32>
    %155 = vector.multi_reduction <maximumf>, %154, %cst_86 [1] : vector<16x16xf32> to vector<16xf32>
    %156 = vector.shape_cast %155 : vector<16xf32> to vector<16x1xf32>
    %157 = vector.broadcast %156 : vector<16x1xf32> to vector<16x16xf32>
    %158 = arith.subf %154, %157 : vector<16x16xf32>
    %159 = math.exp %158 : vector<16x16xf32>
    %cst_87 = arith.constant dense<0.000000e+00> : vector<16xf32>
    %160 = vector.multi_reduction <add>, %159, %cst_87 [1] : vector<16x16xf32> to vector<16xf32>
    %161 = vector.shape_cast %160 : vector<16xf32> to vector<16x1xf32>
    %162 = tpu.reciprocal %161 {approx = true} : vector<16x1xf32> -> vector<16x1xf32>
    %cst_88 = arith.constant dense<0.000000e+00> : vector<16x16xf32>
    %163 = tpu.matmul %159, %133, %cst_88 {dimension_numbers = #tpu.dot_dimension_numbers<[1], [1], [0], [0], [0, 0, 1, 0], [], []>} : vector<16x16xf32>, vector<16x16xf32>, vector<16x16xf32> -> vector<16x16xf32>
    %164 = vector.broadcast %162 : vector<16x1xf32> to vector<16x16xf32>
    %165 = arith.mulf %163, %164 : vector<16x16xf32>
    %c0_89 = arith.constant 0 : index
    %c48_90 = arith.constant 48 : index
    %166 = vector.load %arg15[%c0_89, %c48_90] : memref<16x64xf32, #tpu.memory_space<vmem>>, vector<16x16xf32>
    tpu.vector_store %arg15[%c0_89, %c48_90], %165 {strides = array<i32>} : memref<16x64xf32, #tpu.memory_space<vmem>>, vector<16x16xf32>,
    %c0_91 = arith.constant 0 : index
    %c0_92 = arith.constant 0 : index
    %167 = vector.load %arg15[%c0_91, %c0_92] : memref<16x64xf32, #tpu.memory_space<vmem>>, vector<16x64xf32>
    %c0_93 = arith.constant 0 : index
    %c0_94 = arith.constant 0 : index
    %168 = vector.load %arg11[%c0_93, %c0_94] : memref<64x64xf32, #tpu.memory_space<vmem>>, vector<64x64xf32>
    %cst_95 = arith.constant dense<0.000000e+00> : vector<16x64xf32>
    %169 = tpu.matmul %167, %168, %cst_95 {dimension_numbers = #tpu.dot_dimension_numbers<[1], [0], [0], [1], [0, 0, 1, 1], [], []>} : vector<16x64xf32>, vector<64x64xf32>, vector<16x64xf32> -> vector<16x64xf32>
    %c0_96 = arith.constant 0 : index
    %c0_97 = arith.constant 0 : index
    %170 = vector.load %arg12[%c0_96, %c0_97] : memref<1x64xf32, #tpu.memory_space<vmem>>, vector<1x64xf32>
    %171 = vector.broadcast %170 : vector<1x64xf32> to vector<16x64xf32>
    %172 = arith.addf %169, %171 : vector<16x64xf32>
    %c0_98 = arith.constant 0 : index
    %c0_99 = arith.constant 0 : index
    %c0_100 = arith.constant 0 : index
    %173 = vector.load %arg13[%c0_98, %c0_99, %c0_100] : memref<1x16x64xf32, #tpu.memory_space<vmem>>, vector<1x16x64xf32>
    %174 = vector.shape_cast %173 : vector<1x16x64xf32> to vector<16x64xf32>
    %175 = vector.shape_cast %172 : vector<16x64xf32> to vector<1x16x64xf32>
    tpu.vector_store %arg13[%c0_98, %c0_99, %c0_100], %175 {strides = array<i32>} : memref<1x16x64xf32, #tpu.memory_space<vmem>>, vector<1x16x64xf32>,
    return
  }
  func.func @transform_0(%arg0: i32, %arg1: i32) -> (i32, i32, i32) {
    %c0_i32 = arith.constant 0 : i32
    %c0_i32_0 = arith.constant 0 : i32
    %c0_i32_1 = arith.constant 0 : i32
    return %arg0, %c0_i32, %c0_i32_0 : i32, i32, i32
  }
  func.func @transform_1(%arg0: i32, %arg1: i32) -> (i32, i32, i32, i32) {
    %c0_i32 = arith.constant 0 : i32
    %c0_i32_0 = arith.constant 0 : i32
    %c0_i32_1 = arith.constant 0 : i32
    return %arg0, %c0_i32, %arg1, %c0_i32_0 : i32, i32, i32, i32
  }
  func.func @transform_2(%arg0: i32, %arg1: i32) -> (i32, i32, i32) {
    %c0_i32 = arith.constant 0 : i32
    %c0_i32_0 = arith.constant 0 : i32
    return %arg0, %arg1, %c0_i32 : i32, i32, i32
  }
  func.func @transform_3(%arg0: i32, %arg1: i32) -> (i32, i32) {
    %c0_i32 = arith.constant 0 : i32
    %c0_i32_0 = arith.constant 0 : i32
    %c0_i32_1 = arith.constant 0 : i32
    return %c0_i32, %c0_i32_0 : i32, i32
  }
  func.func @transform_4(%arg0: i32, %arg1: i32) -> (i32, i32) {
    %c0_i32 = arith.constant 0 : i32
    %c0_i32_0 = arith.constant 0 : i32
    %c0_i32_1 = arith.constant 0 : i32
    return %c0_i32, %c0_i32_0 : i32, i32
  }
  func.func @transform_5(%arg0: i32, %arg1: i32) -> (i32, i32) {
    %c0_i32 = arith.constant 0 : i32
    %c0_i32_0 = arith.constant 0 : i32
    %c0_i32_1 = arith.constant 0 : i32
    return %c0_i32, %c0_i32_0 : i32, i32
  }
  func.func @transform_6(%arg0: i32, %arg1: i32) -> (i32, i32) {
    %c0_i32 = arith.constant 0 : i32
    %c0_i32_0 = arith.constant 0 : i32
    %c0_i32_1 = arith.constant 0 : i32
    return %c0_i32, %c0_i32_0 : i32, i32
  }
  func.func @transform_7(%arg0: i32, %arg1: i32) -> (i32, i32) {
    %c0_i32 = arith.constant 0 : i32
    %c0_i32_0 = arith.constant 0 : i32
    %c0_i32_1 = arith.constant 0 : i32
    return %c0_i32, %c0_i32_0 : i32, i32
  }
  func.func @transform_8(%arg0: i32, %arg1: i32) -> i32 {
    %c0_i32 = arith.constant 0 : i32
    %c0_i32_0 = arith.constant 0 : i32
    return %c0_i32 : i32
  }
  func.func @transform_9(%arg0: i32, %arg1: i32) -> (i32, i32) {
    %c0_i32 = arith.constant 0 : i32
    %c0_i32_0 = arith.constant 0 : i32
    %c0_i32_1 = arith.constant 0 : i32
    return %c0_i32, %c0_i32_0 : i32, i32
  }
  func.func @transform_10(%arg0: i32, %arg1: i32) -> (i32, i32) {
    %c0_i32 = arith.constant 0 : i32
    %c0_i32_0 = arith.constant 0 : i32
    %c0_i32_1 = arith.constant 0 : i32
    return %c0_i32, %c0_i32_0 : i32, i32
  }
  func.func @transform_11(%arg0: i32, %arg1: i32) -> (i32, i32, i32) {
    %c0_i32 = arith.constant 0 : i32
    %c0_i32_0 = arith.constant 0 : i32
    return %arg0, %arg1, %c0_i32 : i32, i32, i32
  }
}

</mosaic_0001>

<bundles_post_ra>
// kernel: tpu_custom_call.1
= control target key start
LH: loop header
LB: loop body
LE: loop exit
PB: predicated region body
PF: predicated region fallthrough
CT: control target
= control target key end

     0   :  { %s3409_s0 = inlined_call_operand.vmem [shape: f32[2,16,16], index: 0, kind: input, shape index: {}]   ;;  %s3410_s1 = inlined_call_operand.vmem [shape: f32[2,4,16,16], index: 1, kind: input, shape index: {}]   ;;  %s3411_s2 = inlined_call_operand.vmem [shape: f32[2,16,16], index: 2, kind: input, shape index: {}]   ;;  %s3412_s3 = inlined_call_operand.vmem [shape: f32[64,16], index: 3, kind: input, shape index: {}]   ;;  %s3413_s4 = inlined_call_operand.vmem [shape: f32[1,64], index: 4, kind: input, shape index: {}]   ;;  %s3414_s5 = inlined_call_operand.vmem [shape: f32[128,16], index: 5, kind: input, shape index: {}]   ;;  %s3415_s6 = inlined_call_operand.vmem [shape: f32[128,1], index: 6, kind: input, shape index: {}]   ;;  %s3416_s7 = inlined_call_operand.vmem [shape: f32[4,4], index: 7, kind: input, shape index: {}]   ;;  %s3417_s8 = inlined_call_operand.vmem [shape: f32[4], index: 8, kind: input, shape index: {}]   ;;  %s3418_s9 = inlined_call_operand.vmem [shape: f32[64,64], index: 9, kind: input, shape index: {}]   ;;  %s3419_s10 = inlined_call_operand.vmem [shape: f32[1,64], index: 10, kind: input, shape index: {}]   ;;  %s3420_s11 = inlined_call_operand.hbm [shape: f32[2,16,64], index: 11, kind: output, shape index: {}]  }
   0x1   :  { %3427 = sst [smem:[#allocation14_spill]] %s3409_s0 }
   0x2   :  { %3428 = sst [smem:[#allocation15_spill]] %s3412_s3 }
   0x3   :  { %3429 = sst [smem:[#allocation16_spill]] %s3416_s7 }
   0x4   :  { %16 = vsyncpa [#allocation6], 0 }
   0x5   :  { %17 = vsyncpa [#allocation8], 0 }
   0x6   :  { %18 = vsyncpa [#allocation5], 0 }
   0x7   :  { %20 = vsyncpa [#allocation5 + $0x1], 0  ;;  %s2842_s17 = smov 0   ;;  %s2844_s18 = smov 0  }
   0x8   :  { %s2846_s19 = smov 0   ;;  %s2848_s20 = smov 0  }
   0x9   :  { %s2850_s21 = smov 0   ;;  %s2852_s22 = smov 0  }
   0xa LB: > { %s2150_s23 = sadd.s32 4294967295, %s2768_s22   ;;  %s2151_s24 = sadd.s32 4294967294, %s2768_s22   ;;  %s2768_s22 = sphi %s2852_s22, %s26_s22   ;;  %s2764_s21 = sphi %s2850_s21, %s3451_s21   ;;  %s2760_s20 = sphi %s2848_s20, %s3450_s20   ;;  %s2756_s19 = sphi %s2846_s19, %s3449_s19   ;;  %s2752_s18 = sphi %s2844_s18, %s3448_s18   ;;  %s2748_s17 = sphi %s2842_s17, %s3447_s17  }
   0xb   : > { %s38_s25 = sadd.s32 1, %s2764_s21  ;;  %s297_s26 = sadd.s32 1, %s2756_s19 }
   0xc   : > { %p40_p0 = scmp.ge.s32.totalorder %s38_s25, 2  ;;  %p307_p1 = scmp.ne.s32.totalorder %s2756_s19, %s2752_s18 }
   0xd   : > { %p308_p2 = scmp.eq.s32.totalorder %s2150_s23, 1  ;;  %p313_p3 = scmp.ne.s32.totalorder %s2752_s18, %s2748_s17 }
   0xe   : > { %s3453_s25 = smov (%p40_p0, %s38_s25), 0  ;;  %p314_p5 = scmp.eq.s32.totalorder %s2151_s24, 1 }
   0xf   : > { %3430 = sst [smem:[#allocation13_spill]] %s3453_s25  ;;  %p2882_p4 = por %p308_p2, %p307_p1 }
  0x10   : > { %s292_s28 = ssub.s32 %s2764_s21, %s3453_s25  ;;  %p2152_p6 = scmp.ge.s32.totalorder %s2768_s22, 1 }
  0x11   : > { %s3431_s27 = scalar_select %p2882_p4, 1, 0 }
  0x12   : > { %p295_p7 = scmp.eq.s32.totalorder %s292_s28, 0  ;;  %p2889_p8 = por %p314_p5, %p313_p3 }
  0x13   : > { %p321_p9 = scmp.lt.s32.totalorder %s2768_s22, 3  ;;  %p2901_p11 = scmp.eq.s32.totalorder %s2150_s23, 0 }
  0x14   : > { %s3432_s29 = scalar_select %p2889_p8, 1, 0 }
  0x15   : > { %s2895_s30 = scalar_select %p295_p7, %s2756_s19, %s297_s26  }
  0x16   : > { %p2897_p10 = pnand %p2152_p6, %p321_p9  ;;  %s3435_s7 = sld [smem:[#allocation16_spill]] }
  0x17   : > { %s3434_s13 = scalar_select %p2901_p11, 1, 0 }
  0x18   : > { %s3433_s12 = scalar_select %p2897_p10, 1, 0 }
  0x19   : > { %p2543_p12 = pneg %p2897_p10  ;;  %s357_s26 = sshll.u32 %s3417_s8, 4  ;;  %s358_s26 = int_to_ptr.vmem [resolvable:$true] %s357_s26 }
  0x1b   : > { %p2915_p13 = pnand %p2901_p11, %p2543_p12 }
  0x1c   : > { %s346_s16 = sshll.u32 %s3435_s7, 4  ;;  %s347_s16 = int_to_ptr.vmem [resolvable:$true] %s346_s16 }
  0x1d   : > { %s2652_s23 = scalar_lea.vmem %s347_s16, 64  ;;  %p2654_p1 = pneg %p2915_p13 }
  0x1e   : > { %p2653_p0 = scmp.ne.s32.totalorder %s347_s16, %s2652_s23  ;;  %p2660_p5 = scmp.lt.s32.totalorder %s347_s16, %s347_s16 }
  0x1f   : > { %p2661_p6 = scmp.lt.s32.totalorder %s2652_s23, %s2652_s23 }
  0x20   : > { %p2655_p2 = pnand %p2654_p1, %p2653_p0 }
  0x21   : > { %p2662_p7 = por %p2661_p6, %p2660_p5 }
  0x22   : > { %p2656_p3 = pneg %p2655_p2 }
  0x24   : > { %p2663_p9 = pnand %p2662_p7, %p2656_p3 }
  0x26   : > { %2666 = shalt.err (!%p2663_p9)
}
  0x27   : > { %s2770_s14 = smov [#allocation4]   ;;  %s2667_s15 = scalar_lea.vmem %s358_s26, 16 }
  0x28   : > { %2546 = dma.vmem_to_smem (!%p2915_p13), %s347_s16, 64, %s2770_s14, [#allocation6]  }
  0x29   : > { %p2668_p12 = scmp.ne.s32.totalorder %s358_s26, %s2667_s15  ;;  %p2675_p11 = scmp.lt.s32.totalorder %s358_s26, %s358_s26 }
  0x2a   : > { %p2676_p10 = scmp.lt.s32.totalorder %s2667_s15, %s2667_s15 }
  0x2b   : > { %p2670_p8 = pnand %p2668_p12, %p2654_p1 }
  0x2c   : > { %p2677_p0 = por %p2676_p10, %p2675_p11 }
  0x2d   : > { %p2671_p4 = pneg %p2670_p8 }
  0x2f   : > { %p2678_p2 = pnand %p2677_p0, %p2671_p4 }
  0x31   : > { %2681 = shalt.err (!%p2678_p2)
}
  0x32   : > { %s2771_s24 = smov [#allocation7]   ;;  %p3437_p3 = scmp.ne.s32.totalorder %s3433_s12, 0 }
  0x33   : > { %2549 = dma.vmem_to_smem (!%p2915_p13), %s358_s26, 16, %s2771_s24, [#allocation8]  }
  0x34   : > { %410 = sbr.rel (%p3437_p3) target bundleno = 2078 (0x81e), region = 64  ;;  %p3438_p5 = scmp.ne.s32.totalorder (!%p3437_p3), %s3434_s13, 0 }
  0x3b   : > { %2735 = dma.done.wait (%p3438_p5), [#allocation6], 64  }
  0x3c   : > { %2737 = vsyncadd (%p3438_p5), [#allocation6], 4294967232 }
  0x3d   : > { %2739 = dma.done.wait (%p3438_p5), [#allocation8], 16  }
  0x3e   : > { %2741 = vsyncadd (%p3438_p5), [#allocation8], 4294967280 }
  0x3f   : > { %420 = sfence }
  0x40   : > { %vm617_vm0 = vcmask 130048   ;;  %s3439_s3 = sld [smem:[#allocation15_spill]]  ;;  %p473_p4 = scmp.lt.s32.totalorder %s2760_s20, 1  ;;  %v505_v6 = vld [vmem:[%s3414_s5] sm:$0xff]  ;;  %v2772_v7 = vmov 0   ;;  %v522_v16 = vld [vmem:[%s3415_s6 + $0x8] sm:$0xff] }
  0x41   : > { %vm2947_vm1 = vmpackc.low %vm617_vm0, %vm617_vm0  ;;  %2618 = vset.pattern.permute.xlu0 %v2772_v7  ;;  %2619 = vset.pattern.permute.xlu1 %v2772_v7  ;;  %s3442_s0 = sld [smem:[#allocation14_spill]]  ;;  %v521_v14 = vld [vmem:[%s3415_s6] sm:$0xff]  ;;  %v506_v18 = vld [vmem:[%s3414_s5 + $0x8] sm:$0xff]  ;;  %s2773_s14 = smov 112   ;;  %vm1427_vm2 = vcmask 261248   ;;  %vm1662_vm3 = vcmask 392448  }
  0x42   : > { %s2958_s16 = scalar_select %p473_p4, %s2760_s20, 1  ;;  %2329 = vmatprep.mubr.msk.f32.mxu0 %vm617_vm0, %v505_v6  ;;  %539 = vperm.xlu0 %2618, %v521_v14   ;;  %v529_v17 = vld [vmem:[%s3415_s6 + $0x40] sm:$0xff]  ;;  %v507_v21 = vld [vmem:[%s3414_s5 + $0x10] sm:$0xff]  ;;  %v508_v24 = vld [vmem:[%s3414_s5 + $0x18] sm:$0xff]  ;;  %vm1897_vm4 = vcmask 523648   ;;  %vm1917_vm5 = vcmask 523264  }
  0x43   : > { %v523_v23 = vld [vmem:[%s3415_s6 + $0x10] sm:$0xff]  ;;  %v509_v25 = vld [vmem:[%s3414_s5 + $0x20] sm:$0xff]  ;;  %v524_v26 = vld [vmem:[%s3415_s6 + $0x18] sm:$0xff]  ;;  %s979_s23 = sld [smem:[#allocation4]]  ;;  %s2212_s15 = sld [smem:[#allocation4 + $0x81]] }
  0x44   : > { %s3426_s25 = sshll.u32 %s2958_s16, 4  ;;  %v510_v27 = vld [vmem:[%s3414_s5 + $0x28] sm:$0xff]  ;;  %v511_v28 = vld [vmem:[%s3414_s5 + $0x30] sm:$0xff]  ;;  %v512_v29 = vld [vmem:[%s3414_s5 + $0x38] sm:$0xff]  ;;  %s2252_s13 = sshll.u32 %s2958_s16, 6 }
  0x45   : > { %v513_v30 = vld [vmem:[%s3414_s5 + $0x40] sm:$0xff]  ;;  %v514_v31 = vld [vmem:[%s3414_s5 + $0x48] sm:$0xff]  ;;  %v515_v32 = vld [vmem:[%s3414_s5 + $0x50] sm:$0xff]  ;;  %s486_s24 = scalar_lea.vmem %s3410_s1, %s2252_s13  ;;  %s3443_s12 = sshll.u32 %s2958_s16, 4 }
  0x46   : > { %v837_v0 = vld [vmem:[%s3439_s3] sm:$0xff]  ;;  %v838_v1 = vld [vmem:[%s3439_s3 + $0x8] sm:$0xff]  ;;  %v839_v2 = vld [vmem:[%s3439_s3 + $0x10] sm:$0xff]  ;;  %544 = vperm.xlu0 %2618, %v522_v16   ;;  %s2203_s16 = sld [smem:[#allocation4 + $0x3]]  ;;  %s2210_s13 = sld [smem:[#allocation7 + $0x1]] }
  0x47   : > { %v2453_v4 = vpack.c.bf16 %v838_v1, %v837_v0  ;;  %v840_v5 = vld [vmem:[%s3439_s3 + $0x18] sm:$0xff]  ;;  %s477_s26 = scalar_lea.vmem %s3442_s0, %s3426_s25  ;;  %v841_v9 = vld [vmem:[%s3439_s3 + $0x20] sm:$0xff]  ;;  %v842_v12 = vld [vmem:[%s3439_s3 + $0x28] sm:$0xff]  ;;  %s496_s0 = scalar_lea.vmem %s3411_s2, %s3443_s12 }
  0x48   : > { %v2459_v8 = vpack.c.bf16 %v840_v5, %v839_v2  ;;  %v503_v10 = vld [vmem:[%s477_s26] sm:$0xff]  ;;  %v504_v11 = vld [vmem:[%s477_s26 + $0x8] sm:$0xff]  ;;  %v2465_v15 = vpack.c.bf16 %v842_v12, %v841_v9  ;;  %v843_v19 = vld [vmem:[%s3439_s3 + $0x30] sm:$0xff]  ;;  %s975_s26 = sld [smem:[#allocation7]]  ;;  %s2213_s25 = sld [smem:[#allocation4 + $0x82]] }
  0x49   : > { %2455 = vmatprep.subr.msk.bf16.mxu1 %vm2947_vm1, %v2453_v4  ;;  %v2447_v13 = vpack.c.bf16 %v504_v11, %v503_v10  ;;  %2369 = vmatprep.mubr.msk.f32.mxu1 %vm617_vm0, %v503_v10  ;;  %v844_v20 = vld [vmem:[%s3439_s3 + $0x38] sm:$0xff]  ;;  %v2184_v56 = vld [vmem:[%s3413_s4] ss:$0 sm:$0xff]  ;;  %v531_v63 = vld [vmem:[%s3415_s6 + $0x50] sm:$0xff]  ;;  %s2202_s3 = sld [smem:[#allocation4 + $0x2]]  ;;  %s2775_s12 = smov 80  }
  0x4a   : > { %2458 = vmatpush3.bf16.xpose.msk.msra.mxu1 %vm2947_vm1, %v2453_v4  ;;  %579 = vperm.xlu0 %2618, %v529_v17   ;;  %v2471_v22 = vpack.c.bf16 %v844_v20, %v843_v19  ;;  %v516_v33 = vld [vmem:[%s3414_s5 + $0x58] sm:$0xff]  ;;  %v526_v1 = vld [vmem:[%s3415_s6 + $0x28] sm:$0xff]  ;;  %v3115_v16 = vld [vmem:[%s496_s0] sm:$0xff]  ;;  %s2221_s28 = sld [smem:[#allocation7 + $0x2]]  ;;  %s2222_s7 = sld [smem:[#allocation4 + $0x100]] }
  0x4b   : > { %2461 = vmatprep.subr.msk.bf16.mxu1 %vm2947_vm1, %v2459_v8  ;;  %2449 = vmatprep.subr.msk.bf16.mxu0 %vm2947_vm1, %v2447_v13  ;;  %v528_v2 = vld [vmem:[%s3415_s6 + $0x38] sm:$0xff]  ;;  %v3111_v12 = vld [vmem:[%s496_s0 + $0x8] sm:$0xff]  ;;  %v3117_v17 = vld [vmem:[%s486_s24] sm:$0xff]  ;;  %s2224_s0 = sld [smem:[#allocation4 + $0x102]]  ;;  %p3444_p10 = scmp.ne.s32.totalorder %s3431_s27, 0 }
  0x4c   : > { %2452 = vmatpush3.bf16.xpose.msk.msra.mxu0 %vm2947_vm1, %v2447_v13  ;;  %v3113_v13 = vld [vmem:[%s486_s24 + $0x8] sm:$0xff]  ;;  %v3121_v20 = vld [vmem:[%s486_s24 + $0x18] sm:$0xff] }
  0x4e   : > { %549 = vperm.xlu0 %2618, %v523_v23   ;;  %v976_v14 = vstv %s975_s26  ;;  %s2776_s26 = smov 16  }
  0x52   : > { %2464 = vmatpush3.bf16.xpose.msk.msra.mxu1 %vm2947_vm1, %v2459_v8  ;;  %554 = vperm.xlu0 %2618, %v524_v26  }
  0x53   : > { %2467 = vmatprep.subr.msk.bf16.mxu1 %vm2947_vm1, %v2465_v15  ;;  %2330 = vmatmul.mubr.msk.f32.vlgmr.msra.gmra.mrb[0].mxu0 %vm617_vm0, %v506_v18  ;;  %v978_v18 = vadd.f32 %v976_v14, %v3111_v12 }
  0x54   : > { %2332 = vmatprep.mubr.msk.f32.mxu0 %vm617_vm0, %v507_v21 }
  0x57   : > { %2333 = vmatmul.mubr.msk.f32.gmra.mrb[2].mxu0 %vm617_vm0, %v508_v24  ;;  %v3125_v24 = vld [vmem:[%s486_s24 + $0x10] sm:$0xff] }
  0x58   : > { %2335 = vmatprep.mubr.msk.f32.mxu0 %vm617_vm0, %v509_v25 }
  0x5a   : > { %2470 = vmatpush3.bf16.xpose.msk.msra.mxu1 %vm2947_vm1, %v2465_v15  ;;  %v980_v15 = vstv %s979_s23  ;;  %s2774_s23 = smov 96  }
  0x5b   : > { %2473 = vmatprep.subr.msk.bf16.mxu1 %vm2947_vm1, %v2471_v22  ;;  %2336 = vmatmul.mubr.msk.f32.gmra.mrb[4].mxu0 %vm617_vm0, %v510_v27  ;;  %v982_v19 = vmul.f32 %v980_v15, %v3113_v13  ;;  %v981_v23 = vmul.f32 %v980_v15, %v3117_v17  ;;  %v3128_v27 = vld [vmem:[%s486_s24 + $0x28] sm:$0xff] }
  0x5c   : > { %2338 = vmatprep.mubr.msk.f32.mxu0 %vm617_vm0, %v511_v28  ;;  %v992_v28 = vstv %s2202_s3  ;;  %s2225_s3 = sld [smem:[#allocation4 + $0x103]] }
  0x5d   : > { %v984_v25 = vadd.f32 %v982_v19, %v978_v18 }
  0x5f   : > { %2339 = vmatmul.mubr.msk.f32.gmra.mrb[6].mxu0 %vm617_vm0, %v512_v29 }
  0x60   : > { %2341 = vmatprep.mubr.msk.f32.mxu0 %vm617_vm0, %v513_v30 }
  0x62   : > { %2476 = vmatpush3.bf16.xpose.msk.msra.mxu1 %vm2947_vm1, %v2471_v22  ;;  %v977_v22 = vadd.f32 %v976_v14, %v3115_v16 }
  0x63   : > { %2342 = vmatmul.mubr.msk.f32.gmra.mrb[8].mxu0 %vm617_vm0, %v514_v31  ;;  %v3131_v31 = vld [vmem:[%s486_s24 + $0x20] sm:$0xff] }
  0x64   : > { %2344 = vmatprep.mubr.msk.f32.mxu0 %vm617_vm0, %v515_v32  ;;  %v983_v29 = vadd.f32 %v981_v23, %v977_v22 }
  0x67   : > { %2345 = vmatmul.mubr.msk.f32.gmra.mrb[10].mxu0 %vm617_vm0, %v516_v33  ;;  %v994_v33 = vmul.f32 %v3128_v27, %v992_v28 }
  0x69   : > { %2370 = vmatmul.mubr.msk.f32.vlgmr.msra.gmra.mrb[0].mxu1 %vm617_vm0, %v504_v11 }
  0xc1   : > { %v540_v34 = vpop.permute.xlu0 %539 }
  0xc5   : > { %v545_v35 = vpop.permute.xlu0 %544 }
  0xc9   : > { %v580_v36 = vpop.permute.xlu0 %579 }
  0xcd   : > { %v550_v37 = vpop.permute.xlu0 %549 }
  0xd1   : > { %v555_v42 = vpop.permute.xlu0 %554 }
 0x126   : > { %v2331_v38 = vpop.f32.mrb[0].mxu0 }
 0x127   : > { %v744_v39 = vadd.f32 %v2331_v38, %v545_v35  ;;  %v738_v40 = vpop.f32.mrb[1].mxu0  ;;  %v998_v35 = vstv %s2203_s16  ;;  %v3137_v38 = vld [vmem:[%s486_s24 + $0x30] sm:$0xff]  ;;  %s2223_s16 = sld [smem:[#allocation4 + $0x101]] }
 0x128   : > { %v739_v41 = vadd.f32 %v738_v40, %v540_v34  ;;  %v3134_v34 = vld [vmem:[%s486_s24 + $0x38] sm:$0xff]  ;;  %s2214_s24 = sld [smem:[#allocation4 + $0x83]] }
 0x129   : > { %818 = vst.msk [vmem:[#allocation2 + $0x8] sm:$0xff] %vm617_vm0, %v744_v39  ;;  %v1000_v40 = vmul.f32 %v3134_v34, %v998_v35 }
 0x12a   : > { %817 = vst.msk [vmem:[#allocation2] sm:$0xff] %vm617_vm0, %v739_v41  ;;  %v2334_v43 = vpop.f32.mrb[2].mxu0 }
 0x12b   : > { %v754_v44 = vadd.f32 %v2334_v43, %v555_v42  ;;  %v748_v45 = vpop.f32.mrb[3].mxu0  ;;  %v999_v42 = vmul.f32 %v3137_v38, %v998_v35 }
 0x12c   : > { %v749_v46 = vadd.f32 %v748_v45, %v550_v37  ;;  %v993_v37 = vmul.f32 %v3131_v31, %v992_v28 }
 0x12d   : > { %820 = vst.msk [vmem:[#allocation2 + $0x18] sm:$0xff] %vm617_vm0, %v754_v44 }
 0x12e   : > { %819 = vst.msk [vmem:[#allocation2 + $0x10] sm:$0xff] %vm617_vm0, %v749_v46  ;;  %v2337_v47 = vpop.f32.mrb[4].mxu0 }
 0x12f   : > { %v3064_v48 = vpop.f32.mrb[5].mxu0 }
 0x130   : > { %v972_v49 = vld [vmem:[#allocation2 + $0x8] sm:$0xff] }
 0x131   : > { %v971_v50 = vld [vmem:[#allocation2] sm:$0xff] }
 0x132   : > { %v2340_v51 = vpop.f32.mrb[6].mxu0  ;;  %v2477_v52 = vpack.c.bf16 %v972_v49, %v971_v50 }
 0x133   : > { %v3066_v53 = vpop.f32.mrb[7].mxu0 }
 0x134   : > { %2478 = vmatprep.subr.bf16.mxu1 %v2477_v52 }
 0x135   : > { %2480 = vmatpush3.bf16.msra.mxu1 %v2477_v52  ;;  %v530_v52 = vld [vmem:[%s3415_s6 + $0x48] sm:$0xff] }
 0x136   : > { %v3068_v54 = vpop.f32.mrb[8].mxu0 }
 0x137   : > { %v778_v55 = vpop.f32.mrb[9].mxu0 }
 0x138   : > { %v779_v57 = vadd.f32 %v778_v55, %v580_v36  ;;  %v532_v55 = vld [vmem:[%s3415_s6 + $0x58] sm:$0xff] }
 0x13a   : > { %825 = vst.msk [vmem:[#allocation2 + $0x40] sm:$0xff] %vm617_vm0, %v779_v57  ;;  %v3076_v61 = vpop.f32.mrb[10].mxu0  ;;  %v517_v57 = vld [vmem:[%s3414_s5 + $0x60] sm:$0xff] }
 0x13b   : > { %v788_v0 = vpop.f32.mrb[11].mxu0  ;;  %2347 = vmatprep.mubr.msk.f32.mxu0 %vm617_vm0, %v517_v57 }
 0x13c   : > { %v2371_v58 = vpop.f32.mrb[0].mxu1 }
 0x13d   : > { %v949_v59 = vpop.f32.mrb[1].mxu1  ;;  %v3078_v62 = vadd.f32 %v2371_v58, %v2184_v56  ;;  %v518_v58 = vld [vmem:[%s3414_s5 + $0x68] sm:$0xff] }
 0x13e   : > { %v3074_v60 = vadd.f32 %v2184_v56, %v949_v59  ;;  %v525_v56 = vld [vmem:[%s3415_s6 + $0x20] sm:$0xff]  ;;  %2348 = vmatmul.mubr.msk.f32.gmra.mrb[12].mxu0 %vm617_vm0, %v518_v58  ;;  %v527_v59 = vld [vmem:[%s3415_s6 + $0x30] sm:$0xff] }
 0x140   : > { %1227 = vrot.lane.b32.xlu0 %v3074_v60, %s2773_s14  ;;  %2376 = vmatprep.mubr.msk.f32.mxu1 %vm617_vm0, %v3074_v60 }
 0x141   : > { %2377 = vmatmul.mubr.msk.f32.vlgmr.msra.gmra.mrb[2].mxu1 %vm617_vm0, %v3078_v62  ;;  %v973_v22 = vld [vmem:[#allocation2 + $0x40] sm:$0xff] }
 0x144   : > { %1229 = vrot.lane.b32.xlu0 %v3078_v62, %s2773_s14  ;;  %s2201_s14 = sld [smem:[#allocation4 + $0x1]] }
 0x148   : > { %589 = vperm.xlu0 %2618, %v531_v63   ;;  %v519_v63 = vld [vmem:[%s3414_s5 + $0x70] sm:$0xff] }
 0x149   : > { %2350 = vmatprep.mubr.msk.f32.mxu0 %vm617_vm0, %v519_v63 }
 0x14a   : > { %v986_v21 = vstv %s2201_s14  ;;  %s2211_s14 = sld [smem:[#allocation4 + $0x80]] }
 0x14b   : > { %v988_v26 = vmul.f32 %v3121_v20, %v986_v21  ;;  %v987_v30 = vmul.f32 %v3125_v24, %v986_v21  ;;  %v1196_v21 = vld [vmem:[#allocation2 + $0x18] sm:$0xff] }
 0x14c   : > { %564 = vperm.xlu0 %2618, %v526_v1  }
 0x14d   : > { %v990_v32 = vadd.f32 %v988_v26, %v984_v25  ;;  %v989_v36 = vadd.f32 %v987_v30, %v983_v29  ;;  %v1195_v25 = vld [vmem:[#allocation2 + $0x10] sm:$0xff] }
 0x14f   : > { %v996_v39 = vadd.f32 %v994_v33, %v990_v32  ;;  %v995_v41 = vadd.f32 %v993_v37, %v989_v36 }
 0x150   : > { %574 = vperm.xlu0 %2618, %v528_v2  }
 0x151   : > { %v1002_v43 = vadd.f32 %v1000_v40, %v996_v39  ;;  %v1001_v44 = vadd.f32 %v999_v42, %v995_v41 }
 0x1b2   : > { %v3095_v4 = vpop.permute.xlu0 %1227 }
 0x1b6   : > { %v3097_v5 = vpop.permute.xlu0 %1229 }
 0x1c7   : > { %v590_v6 = vpop.permute.xlu0 %589 }
 0x1c8   : > { %v789_v7 = vadd.f32 %v788_v0, %v590_v6  ;;  %v520_v0 = vld [vmem:[%s3414_s5 + $0x78] sm:$0xff] }
 0x1c9   : > { %2351 = vmatmul.mubr.msk.f32.gmra.mrb[14].mxu0 %vm617_vm0, %v520_v0  ;;  %v1222_v0 = vstv %s2214_s24  ;;  %s2234_s24 = sld [smem:[#allocation4 + $0x181]] }
 0x1ca   : > { %827 = vst.msk [vmem:[#allocation2 + $0x50] sm:$0xff] %vm617_vm0, %v789_v7 }
 0x1cb   : > { %v565_v8 = vpop.permute.xlu0 %564 }
 0x1cc   : > { %v764_v9 = vadd.f32 %v2337_v47, %v565_v8 }
 0x1ce   : > { %822 = vst.msk [vmem:[#allocation2 + $0x28] sm:$0xff] %vm617_vm0, %v764_v9 }
 0x1cf   : > { %v575_v10 = vpop.permute.xlu0 %574 }
 0x1d0   : > { %v774_v11 = vadd.f32 %v2340_v51, %v575_v10 }
 0x1d2   : > { %824 = vst.msk [vmem:[#allocation2 + $0x38] sm:$0xff] %vm617_vm0, %v774_v11 }
 0x1d5   : > { %v1431_v32 = vld [vmem:[#allocation2 + $0x28] sm:$0xff] }
 0x1d9   : > { %v1666_v40 = vld [vmem:[#allocation2 + $0x38] sm:$0xff] }
 0x211   : > { %v3205_v42 = vpop.f32.mrb[12].mxu0 }
 0x214   : > { %v2378_v45 = vpop.f32.mrb[2].mxu1 }
 0x215   : > { %v1081_v46 = vadd.f32 %v2378_v45, %v1002_v43  ;;  %v1075_v47 = vpop.f32.mrb[3].mxu1  ;;  %v3207_v43 = vpop.f32.mrb[13].mxu0  ;;  %v1204_v45 = vstv %s2211_s14  ;;  %s2233_s14 = sld [smem:[#allocation4 + $0x180]] }
 0x216   : > { %v1076_v49 = vadd.f32 %v1075_v47, %v1001_v44  ;;  %v1206_v47 = vmul.f32 %v1204_v45, %v3113_v13 }
 0x217   : > { %v1087_v50 = vsel %vm617_vm0, %v1081_v46, -inf }
 0x218   : > { %1088 = vmax.xlane.f32.xlu1 %v1087_v50  ;;  %v1084_v51 = vsel %vm617_vm0, %v1076_v49, -inf }
 0x21c   : > { %1085 = vmax.xlane.f32.xlu1 %v1084_v51  ;;  %v1205_v51 = vmul.f32 %v1204_v45, %v3117_v17 }
 0x22d   : > { %584 = vperm.xlu1 %2619, %v530_v52  }
 0x231   : > { %594 = vperm.xlu1 %2619, %v532_v55  }
 0x235   : > { %559 = vperm.xlu1 %2619, %v525_v56   ;;  %v1216_v56 = vstv %s2213_s25  ;;  %s2778_s25 = smov 48  }
 0x236   : > { %v1218_v63 = vmul.f32 %v3128_v27, %v1216_v56 }
 0x239   : > { %569 = vperm.xlu1 %2619, %v527_v59  }
 0x23d   : > { %1462 = vrot.lane.b32.xlu1 %v3074_v60, %s2774_s23 }
 0x2a5   : > { %v1089_v1 = vpop.xlane.xlu1 %1088 }
 0x2a6   : > { %v1091_v10 = vsub.f32 %v1081_v46, %v1089_v1 }
 0x2a8   : > { %v1094_v15 = vmul.f32 1.442695, %v1091_v10 }
 0x2a9   : > { %v1086_v2 = vpop.xlane.xlu1 %1085 }
 0x2aa   : > { %v1090_v6 = vsub.f32 %v1076_v49, %v1086_v2  ;;  %v1210_v49 = vstv %s2212_s15  ;;  %v1217_v2 = vmul.f32 %v3131_v31, %v1216_v56  ;;  %v1457_v56 = vstv %s2225_s3  ;;  %s2254_s3 = sshll.u32 %s2760_s20, 8  ;;  %s2779_s15 = smov [#allocation9]  }
 0x2ab   : > { %v1212_v55 = vmul.f32 %v3121_v20, %v1210_v49  ;;  %v1211_v58 = vmul.f32 %v3125_v24, %v1210_v49  ;;  %v1451_v49 = vstv %s2224_s0 }
 0x2ac   : > { %v1092_v7 = vmul.f32 1.442695, %v1090_v6 }
 0x2ad   : > { %v585_v8 = vpop.permute.xlu1 %584 }
 0x2ae   : > { %2620 = vpow2.f32 %v1092_v7  ;;  %v784_v9 = vadd.f32 %v3068_v54, %v585_v8  ;;  %v1224_v7 = vmul.f32 %v3134_v34, %v1222_v0 }
 0x2af   : > { %2622 = vpow2.f32 %v1094_v15 }
 0x2b0   : > { %826 = vst.msk [vmem:[#allocation2 + $0x48] sm:$0xff] %vm617_vm0, %v784_v9  ;;  %v1223_v9 = vmul.f32 %v3137_v38, %v1222_v0 }
 0x2b1   : > { %v595_v11 = vpop.permute.xlu1 %594 }
 0x2b2   : > { %v794_v14 = vadd.f32 %v3076_v61, %v595_v11 }
 0x2b4   : > { %828 = vst.msk [vmem:[#allocation2 + $0x58] sm:$0xff] %vm617_vm0, %v794_v14 }
 0x2b5   : > { %v560_v18 = vpop.permute.xlu1 %559 }
 0x2b6   : > { %v759_v19 = vadd.f32 %v3064_v48, %v560_v18  ;;  %v2487_v48 = vpack.c.bf16 %v1196_v21, %v1195_v25 }
 0x2b7   : > { %v974_v23 = vld [vmem:[#allocation2 + $0x48] sm:$0xff] }
 0x2b8   : > { %v3178_v26 = vpop.eup %2620  ;;  %821 = vst.msk [vmem:[#allocation2 + $0x20] sm:$0xff] %vm617_vm0, %v759_v19  ;;  %v2481_v54 = vpack.c.bf16 %v974_v23, %v973_v22 }
 0x2b9   : > { %2383 = vmatprep.mubr.msk.f32.mxu0 %vm617_vm0, %v3178_v26  ;;  %v570_v61 = vpop.permute.xlu1 %569  ;;  %v3190_v36 = vpop.eup %2622 }
 0x2ba   : > { %v769_v28 = vadd.f32 %v3066_v53, %v570_v61  ;;  %2483 = vmatprep.subr.msk.bf16.mxu0 %vm2947_vm1, %v2481_v54  ;;  %v1197_v53 = vld [vmem:[#allocation2 + $0x50] sm:$0xff] }
 0x2bb   : > { %2486 = vmatpush3.bf16.xpose.msk.msra.mxu0 %vm2947_vm1, %v2481_v54  ;;  %v1198_v33 = vld [vmem:[#allocation2 + $0x58] sm:$0xff] }
 0x2bc   : > { %823 = vst.msk [vmem:[#allocation2 + $0x30] sm:$0xff] %vm617_vm0, %v769_v28  ;;  %2488 = vmatprep.subr.bf16.mxu0 %v2487_v48  ;;  %v2491_v37 = vpack.c.bf16 %v1198_v33, %v1197_v53  ;;  %v1435_v53 = vstv %s2221_s28  ;;  %s2236_s28 = sld [smem:[#allocation4 + $0x183]] }
 0x2bd   : > { %v1463_v29 = vpop.permute.xlu1 %1462  ;;  %v1436_v45 = vadd.f32 %v1435_v53, %v3115_v16 }
 0x2be   : > { %2404 = vmatprep.mubr.msk.f32.mxu1 %vm617_vm0, %v1463_v29 }
 0x2bf   : > { %v1430_v30 = vld [vmem:[#allocation2 + $0x20] sm:$0xff] }
 0x2c0   : > { %v2497_v35 = vpack.c.bf16 %v1431_v32, %v1430_v30 }
 0x2c2   : > { %2384 = vmatmul.mubr.msk.f32.vlgmr.msra.gmra.mrb[16].mxu0 %vm617_vm0, %v3190_v36  ;;  %2498 = vmatprep.subr.bf16.mxu1 %v2497_v35 }
 0x2c3   : > { %2490 = vmatpush3.bf16.msra.mxu0 %v2487_v48  ;;  %2390 = vmatprep.mubr.msk.f32.mxu0 %vm617_vm0, %v3095_v4  ;;  %v1665_v39 = vld [vmem:[#allocation2 + $0x30] sm:$0xff]  ;;  %v3209_v4 = vpop.f32.mrb[14].mxu0 }
 0x2c4   : > { %2500 = vmatpush3.bf16.msra.mxu1 %v2497_v35  ;;  %2493 = vmatprep.subr.msk.bf16.mxu0 %vm2947_vm1, %v2491_v37  ;;  %v3200_v41 = vpack.c.bf16 %v1666_v40, %v1665_v39  ;;  %v3211_v44 = vpop.f32.mrb[15].mxu0  ;;  %v1437_v39 = vadd.f32 %v1435_v53, %v3111_v12 }
 0x2c6   : > { %2391 = vmatmul.mubr.msk.f32.vlgmr.msra.gmra.mrb[18].mxu0 %vm617_vm0, %v3097_v5  ;;  %v1200_v5 = vstv %s2210_s13  ;;  %s2232_s13 = sld [smem:[#allocation7 + $0x3]] }
 0x2c7   : > { %v1202_v46 = vadd.f32 %v1200_v5, %v3111_v12  ;;  %v1201_v50 = vadd.f32 %v1200_v5, %v3115_v16  ;;  %v1445_v5 = vstv %s2223_s16 }
 0x2c9   : > { %v1208_v52 = vadd.f32 %v1206_v47, %v1202_v46  ;;  %v1207_v57 = vadd.f32 %v1205_v51, %v1201_v50  ;;  %v1447_v47 = vmul.f32 %v3121_v20, %v1445_v5  ;;  %v1446_v51 = vmul.f32 %v3125_v24, %v1445_v5 }
 0x2cb   : > { %v1214_v59 = vadd.f32 %v1212_v55, %v1208_v52  ;;  %v1213_v1 = vadd.f32 %v1211_v58, %v1207_v57  ;;  %v1453_v55 = vmul.f32 %v3128_v27, %v1451_v49  ;;  %v1452_v58 = vmul.f32 %v3131_v31, %v1451_v49 }
 0x2cc   : > { %2496 = vmatpush3.bf16.xpose.msk.msra.mxu0 %vm2947_vm1, %v2491_v37  ;;  %v1439_v37 = vstv %s2222_s7  ;;  %s2777_s7 = smov 32  }
 0x2cd   : > { %2508 = vmatprep.subr.bf16.mxu0 %v3200_v41  ;;  %v1220_v6 = vadd.f32 %v1218_v63, %v1214_v59  ;;  %v1219_v8 = vadd.f32 %v1217_v2, %v1213_v1  ;;  %v1441_v40 = vmul.f32 %v1439_v37, %v3113_v13  ;;  %v1459_v63 = vmul.f32 %v3134_v34, %v1457_v56 }
 0x2ce   : > { %v1458_v1 = vmul.f32 %v3137_v38, %v1457_v56 }
 0x2cf   : > { %v1226_v14 = vadd.f32 %v1224_v7, %v1220_v6  ;;  %v1225_v15 = vadd.f32 %v1223_v9, %v1219_v8  ;;  %v1443_v46 = vadd.f32 %v1441_v40, %v1437_v39 }
 0x2d1   : > { %v1449_v52 = vadd.f32 %v1447_v47, %v1443_v46 }
 0x2d3   : > { %v1455_v59 = vadd.f32 %v1453_v55, %v1449_v52 }
 0x2d5   : > { %v1461_v2 = vadd.f32 %v1459_v63, %v1455_v59 }
 0x395   : > { %v3223_v10 = vpop.f32.mrb[16].mxu0 }
 0x396   : > { %v3225_v11 = vpop.f32.mrb[17].mxu0 }
 0x399   : > { %v2392_v18 = vpop.f32.mrb[18].mxu0 }
 0x39a   : > { %v1307_v19 = vadd.f32 %v2392_v18, %v1226_v14  ;;  %v1301_v21 = vpop.f32.mrb[19].mxu0 }
 0x39b   : > { %v1302_v22 = vadd.f32 %v1301_v21, %v1225_v15 }
 0x39c   : > { %v1313_v23 = vsel %vm617_vm0, %v1307_v19, -inf }
 0x39d   : > { %1314 = vmax.xlane.f32.xlu0 %v1313_v23  ;;  %v1310_v25 = vsel %vm617_vm0, %v1302_v22, -inf }
 0x39e   : > { %1311 = vmax.xlane.f32.xlu1 %v1310_v25  ;;  %v534_v25 = vld [vmem:[%s3415_s6 + $0x68] sm:$0xff] }
 0x3af   : > { %1697 = vrot.lane.b32.xlu1 %v3074_v60, %s2775_s12 }
 0x3b3   : > { %1464 = vrot.lane.b32.xlu0 %v3078_v62, %s2774_s23 }
 0x3b7   : > { %1699 = vrot.lane.b32.xlu0 %v3078_v62, %s2775_s12  ;;  %s2235_s12 = sld [smem:[#allocation4 + $0x182]] }
 0x3bd   : > { %v1686_v40 = vstv %s2235_s12 }
 0x42a   : > { %v1315_v54 = vpop.xlane.xlu0 %1314 }
 0x42b   : > { %v1317_v61 = vsub.f32 %v1307_v19, %v1315_v54  ;;  %v1312_v28 = vpop.xlane.xlu1 %1311  ;;  %v533_v54 = vld [vmem:[%s3415_s6 + $0x60] sm:$0xff] }
 0x42c   : > { %v1316_v48 = vsub.f32 %v1302_v22, %v1312_v28  ;;  %v1674_v28 = vstv %s2233_s14 }
 0x42d   : > { %v1320_v29 = vmul.f32 1.442695, %v1317_v61  ;;  %v1670_v61 = vstv %s2232_s13  ;;  %s3359_s13 = scalar_lea.hbm %s3420_s11, %s2254_s3 }
 0x42e   : > { %v1318_v30 = vmul.f32 1.442695, %v1316_v48  ;;  %v1465_v32 = vpop.permute.xlu0 %1464  ;;  %v1671_v48 = vadd.f32 %v1670_v61, %v3115_v16  ;;  %v1688_v16 = vmul.f32 %v3128_v27, %v1686_v40  ;;  %v535_v27 = vld [vmem:[%s3415_s6 + $0x70] sm:$0xff] }
 0x42f   : > { %2405 = vmatmul.mubr.msk.f32.vlgmr.msra.gmra.mrb[4].mxu1 %vm617_vm0, %v1465_v32  ;;  %v1698_v60 = vpop.permute.xlu1 %1697  ;;  %v1676_v32 = vmul.f32 %v1674_v28, %v3113_v13 }
 0x430   : > { %2624 = vpow2.f32 %v1318_v30  ;;  %v1672_v30 = vadd.f32 %v1670_v61, %v3111_v12 }
 0x431   : > { %2626 = vpow2.f32 %v1320_v29  ;;  %v1675_v29 = vmul.f32 %v1674_v28, %v3117_v17 }
 0x432   : > { %v1700_v62 = vpop.permute.xlu0 %1699 }
 0x43a   : > { %v3234_v33 = vpop.eup %2624 }
 0x43b   : > { %v3236_v35 = vpop.eup %2626  ;;  %2397 = vmatprep.mubr.msk.f32.mxu0 %vm617_vm0, %v3234_v33 }
 0x43c   : > { %2398 = vmatmul.mubr.msk.f32.vlgmr.msra.gmra.mrb[20].mxu0 %vm617_vm0, %v3236_v35 }
 0x43d   : > { %2510 = vmatpush3.bf16.msra.mxu0 %v3200_v41  ;;  %2418 = vmatprep.mubr.msk.f32.mxu0 %vm617_vm0, %v1698_v60  ;;  %v1440_v41 = vmul.f32 %v1439_v37, %v3117_v17  ;;  %v1680_v60 = vstv %s2234_s24  ;;  %v1678_v37 = vadd.f32 %v1676_v32, %v1672_v30  ;;  %v1692_v17 = vstv %s2236_s28  ;;  %s470_s24 = sand.u32 1, %s2752_s18  }
 0x43e   : > { %v1681_v53 = vmul.f32 %v3125_v24, %v1680_v60  ;;  %v1682_v39 = vmul.f32 %v3121_v20, %v1680_v60  ;;  %v1693_v12 = vmul.f32 %v3137_v38, %v1692_v17  ;;  %v1694_v47 = vmul.f32 %v3134_v34, %v1692_v17  ;;  %s2159_s12 = sshll.u32 %s470_s24, 4  ;;  %s3363_s14 = scalar_lea.sflag [#allocation5], %s470_s24 }
 0x43f   : > { %v1442_v50 = vadd.f32 %v1440_v41, %v1436_v45  ;;  %v1687_v45 = vmul.f32 %v3131_v31, %v1686_v40  ;;  %v536_v31 = vld [vmem:[%s3415_s6 + $0x78] sm:$0xff]  ;;  %v1325_v34 = vsel %vm617_vm0, %v3236_v35, 0.0  ;;  %v1322_v38 = vsel %vm617_vm0, %v3234_v33, 0.0  ;;  %s472_s16 = scalar_lea.vmem [#allocation9], %s2159_s12 }
 0x440   : > { %2419 = vmatmul.mubr.msk.f32.vlgmr.msra.gmra.mrb[22].mxu0 %vm617_vm0, %v1700_v62  ;;  %v1677_v62 = vadd.f32 %v1675_v29, %v1671_v48  ;;  %v1684_v41 = vadd.f32 %v1682_v39, %v1678_v37  ;;  %v1096_v37 = vsel %vm617_vm0, %v3178_v26, 0.0  ;;  %s2017_s0 = sshll.u32 %s472_s16, 4  ;;  %s3354_s0 = int_to_ptr.vmem [resolvable:$true] %s2017_s0 }
 0x441   : > { %v1448_v57 = vadd.f32 %v1446_v51, %v1442_v50  ;;  %s2682_s20 = scalar_lea.vmem %s3354_s0, 256 }
 0x442   : > { %v1683_v5 = vadd.f32 %v1681_v53, %v1677_v62  ;;  %v1690_v13 = vadd.f32 %v1688_v16, %v1684_v41  ;;  %p2683_p8 = scmp.ne.s32.totalorder %s3354_s0, %s2682_s20 }
 0x443   : > { %v1454_v0 = vadd.f32 %v1452_v58, %v1448_v57 }
 0x444   : > { %v1689_v46 = vadd.f32 %v1687_v45, %v1683_v5  ;;  %v1696_v50 = vadd.f32 %v1694_v47, %v1690_v13  ;;  %p2684_p11 = pnand %p2683_p8, %p3444_p10 }
 0x445   : > { %v1460_v6 = vadd.f32 %v1458_v1, %v1454_v0 }
 0x446   : > { %v1695_v49 = vadd.f32 %v1693_v12, %v1689_v46  ;;  %p2685_p13 = pneg %p2684_p11 }
 0x502   : > { %v2406_v7 = vpop.f32.mrb[4].mxu1 }
 0x503   : > { %v1542_v8 = vadd.f32 %v2406_v7, %v1461_v2  ;;  %v1536_v9 = vpop.f32.mrb[5].mxu1 }
 0x504   : > { %v1537_v14 = vadd.f32 %v1536_v9, %v1460_v6 }
 0x505   : > { %v1548_v15 = vsel %vm617_vm0, %v1542_v8, -inf }
 0x506   : > { %1549 = vmax.xlane.f32.xlu0 %v1548_v15  ;;  %v1545_v18 = vsel %vm617_vm0, %v1537_v14, -inf }
 0x507   : > { %1546 = vmax.xlane.f32.xlu1 %v1545_v18 }
 0x50f   : > { %v3257_v19 = vpop.f32.mrb[20].mxu0 }
 0x510   : > { %v3259_v21 = vpop.f32.mrb[21].mxu0 }
 0x513   : > { %v2420_v22 = vpop.f32.mrb[22].mxu0 }
 0x514   : > { %v1771_v23 = vpop.f32.mrb[23].mxu0  ;;  %v1777_v51 = vadd.f32 %v2420_v22, %v1696_v50 }
 0x515   : > { %v1772_v24 = vadd.f32 %v1771_v23, %v1695_v49 }
 0x516   : > { %v1783_v52 = vsel %vm617_vm0, %v1777_v51, -inf }
 0x517   : > { %v1780_v20 = vsel %vm617_vm0, %v1772_v24, -inf }
 0x518   : > { %604 = vperm.xlu1 %2619, %v534_v25  }
 0x51c   : > { %599 = vperm.xlu0 %2618, %v533_v54  }
 0x53b   : > { %1781 = vmax.xlane.f32.xlu0 %v1780_v20 }
 0x53c   : > { %1784 = vmax.xlane.f32.xlu1 %v1783_v52 }
 0x54d   : > { %609 = vperm.xlu1 %2619, %v535_v27  }
 0x551   : > { %614 = vperm.xlu0 %2618, %v536_v31  }
 0x570   : > { %1326 = vadd.xlane.f32.xlu0 %v1325_v34 }
 0x571   : > { %1323 = vadd.xlane.f32.xlu1 %v1322_v38 }
 0x593   : > { %v1550_v55 = vpop.xlane.xlu0 %1549 }
 0x594   : > { %v1552_v56 = vsub.f32 %v1542_v8, %v1550_v55  ;;  %v1547_v57 = vpop.xlane.xlu1 %1546 }
 0x595   : > { %v1551_v58 = vsub.f32 %v1537_v14, %v1547_v57  ;;  %v1906_v57 = vld [vmem:[%s3418_s9 + $0x20] sm:$0xff] }
 0x596   : > { %v1555_v59 = vmul.f32 1.442695, %v1552_v56 }
 0x597   : > { %v1553_v63 = vmul.f32 1.442695, %v1551_v58  ;;  %v1907_v58 = vld [vmem:[%s3418_s9 + $0x28] sm:$0xff] }
 0x598   : > { %2628 = vpow2.f32 %v1555_v59  ;;  %v605_v0 = vpop.permute.xlu1 %604  ;;  %v2525_v59 = vpack.c.bf16 %v1907_v58, %v1906_v57 }
 0x599   : > { %2630 = vpow2.f32 %v1553_v63  ;;  %v804_v1 = vadd.f32 %v3205_v42, %v605_v0  ;;  %v1908_v63 = vld [vmem:[%s3418_s9 + $0x30] sm:$0xff]  ;;  %v1909_v0 = vld [vmem:[%s3418_s9 + $0x38] sm:$0xff] }
 0x59b   : > { %830 = vst.msk [vmem:[#allocation2 + $0x68] sm:$0xff] %vm617_vm0, %v804_v1  ;;  %v600_v2 = vpop.permute.xlu0 %599  ;;  %v2529_v1 = vpack.c.bf16 %v1909_v0, %v1908_v63 }
 0x59c   : > { %v799_v35 = vadd.f32 %v3207_v43, %v600_v2 }
 0x59e   : > { %829 = vst.msk [vmem:[#allocation2 + $0x60] sm:$0xff] %vm617_vm0, %v799_v35 }
 0x5a2   : > { %v2629_v33 = vpop.eup %2628  ;;  %v1433_v14 = vld [vmem:[#allocation2 + $0x68] sm:$0xff] }
 0x5a3   : > { %v2631_v6 = vpop.eup %2630  ;;  %v1560_v7 = vsel %vm617_vm0, %v2629_v33, 0.0 }
 0x5a4   : > { %1561 = vadd.xlane.f32.xlu1 %v1560_v7  ;;  %2411 = vmatprep.mubr.msk.f32.mxu1 %vm617_vm0, %v2631_v6  ;;  %v1557_v8 = vsel %vm617_vm0, %v2631_v6, 0.0 }
 0x5a5   : > { %1558 = vadd.xlane.f32.xlu0 %v1557_v8  ;;  %v1432_v9 = vld [vmem:[#allocation2 + $0x60] sm:$0xff] }
 0x5a6   : > { %v2501_v42 = vpack.c.bf16 %v1433_v14, %v1432_v9 }
 0x5a8   : > { %2503 = vmatprep.subr.msk.bf16.mxu1 %vm2947_vm1, %v2501_v42 }
 0x5a9   : > { %2506 = vmatpush3.bf16.xpose.msk.msra.mxu1 %vm2947_vm1, %v2501_v42 }
 0x5b0   : > { %2412 = vmatmul.mubr.msk.f32.vlgmr.msra.gmra.mrb[6].mxu1 %vm617_vm0, %v2629_v33 }
 0x5c8   : > { %v1782_v43 = vpop.xlane.xlu0 %1781 }
 0x5c9   : > { %v1786_v15 = vsub.f32 %v1772_v24, %v1782_v43  ;;  %v1785_v18 = vpop.xlane.xlu1 %1784  ;;  %v1905_v24 = vld [vmem:[%s3418_s9 + $0x18] sm:$0xff] }
 0x5ca   : > { %v1787_v22 = vsub.f32 %v1777_v51, %v1785_v18 }
 0x5cb   : > { %v1788_v23 = vmul.f32 1.442695, %v1786_v15 }
 0x5cc   : > { %v1790_v25 = vmul.f32 1.442695, %v1787_v22  ;;  %v2243_v22 = vld [vmem:[%s3419_s10] ss:$0 sm:$0xff] }
 0x5cd   : > { %2632 = vpow2.f32 %v1788_v23  ;;  %v610_v54 = vpop.permute.xlu1 %609 }
 0x5ce   : > { %2634 = vpow2.f32 %v1790_v25  ;;  %v809_v61 = vadd.f32 %v3211_v44, %v610_v54 }
 0x5d0   : > { %831 = vst.msk [vmem:[#allocation2 + $0x70] sm:$0xff] %vm617_vm0, %v809_v61  ;;  %v615_v28 = vpop.permute.xlu0 %614 }
 0x5d1   : > { %v814_v48 = vadd.f32 %v3209_v4, %v615_v28  ;;  %v1099_v4 = vsel %vm617_vm0, %v3190_v36, 0.0 }
 0x5d3   : > { %832 = vst.msk [vmem:[#allocation2 + $0x78] sm:$0xff] %vm617_vm0, %v814_v48 }
 0x5d7   : > { %v2633_v29 = vpop.eup %2632  ;;  %v1667_v62 = vld [vmem:[#allocation2 + $0x70] sm:$0xff] }
 0x5d8   : > { %v2635_v30 = vpop.eup %2634  ;;  %2425 = vmatprep.mubr.msk.f32.mxu0 %vm617_vm0, %v2633_v29  ;;  %v1792_v32 = vsel %vm617_vm0, %v2633_v29, 0.0 }
 0x5d9   : > { %1793 = vadd.xlane.f32.xlu0 %v1792_v32  ;;  %v1795_v60 = vsel %vm617_vm0, %v2635_v30, 0.0 }
 0x5da   : > { %1796 = vadd.xlane.f32.xlu1 %v1795_v60  ;;  %v1668_v53 = vld [vmem:[#allocation2 + $0x78] sm:$0xff] }
 0x5db   : > { %v2511_v44 = vpack.c.bf16 %v1668_v53, %v1667_v62 }
 0x5dd   : > { %1097 = vadd.xlane.f32.xlu0 %v1096_v37  ;;  %2513 = vmatprep.subr.msk.bf16.mxu0 %vm2947_vm1, %v2511_v44 }
 0x5de   : > { %1100 = vadd.xlane.f32.xlu1 %v1099_v4  ;;  %2516 = vmatpush3.bf16.xpose.msk.msra.mxu0 %vm2947_vm1, %v2511_v44 }
 0x5e5   : > { %2426 = vmatmul.mubr.msk.f32.vlgmr.msra.gmra.mrb[24].mxu0 %vm617_vm0, %v2635_v30 }
 0x5fd   : > { %v1327_v39 = vpop.xlane.xlu0 %1326 }
 0x5fe   : > { %2636 = vrcp.f32 %v1327_v39  ;;  %v1324_v40 = vpop.xlane.xlu1 %1323 }
 0x5ff   : > { %2638 = vrcp.f32 %v1324_v40 }
 0x608   : > { %v2637_v5 = vpop.eup %2636 }
 0x609   : > { %v2639_v45 = vpop.eup %2638  ;;  %v1418_v26 = vmul.f32 %v2637_v5, %v3257_v19  ;;  %v1902_v19 = vld [vmem:[%s3418_s9] sm:$0xff] }
 0x60a   : > { %v1417_v41 = vmul.f32 %v2639_v45, %v3259_v21  ;;  %v1903_v21 = vld [vmem:[%s3418_s9 + $0x8] sm:$0xff] }
 0x60b   : > { %1423 = vrot.lane.b32.xlu1 %v1418_v26, %s2776_s26 }
 0x60c   : > { %1421 = vrot.lane.b32.xlu0 %v1417_v41, %s2776_s26 }
 0x631   : > { %v1562_v16 = vpop.xlane.xlu1 %1561 }
 0x632   : > { %v1559_v36 = vpop.xlane.xlu0 %1558 }
 0x666   : > { %v1794_v17 = vpop.xlane.xlu0 %1793 }
 0x667   : > { %v1797_v3 = vpop.xlane.xlu1 %1796 }
 0x66a   : > { %v1098_v46 = vpop.xlane.xlu0 %1097 }
 0x66b   : > { %2640 = vrcp.f32 %v1098_v46  ;;  %v1101_v12 = vpop.xlane.xlu1 %1100 }
 0x66c   : > { %2642 = vrcp.f32 %v1101_v12 }
 0x66d   : > { %2644 = vrcp.f32 %v1562_v16 }
 0x66e   : > { %2646 = vrcp.f32 %v1559_v36 }
 0x66f   : > { %2648 = vrcp.f32 %v1797_v3 }
 0x670   : > { %2650 = vrcp.f32 %v1794_v17 }
 0x675   : > { %v2641_v13 = vpop.eup %2640 }
 0x676   : > { %v2643_v47 = vpop.eup %2642  ;;  %v1191_v49 = vmul.f32 %v2641_v13, %v3225_v11  ;;  %v1904_v11 = vld [vmem:[%s3418_s9 + $0x10] sm:$0xff] }
 0x677   : > { %v1192_v50 = vmul.f32 %v2643_v47, %v3223_v10  ;;  %v2517_v10 = vpack.c.bf16 %v1903_v21, %v1902_v19  ;;  %v2521_v51 = vpack.c.bf16 %v1905_v24, %v1904_v11  ;;  %v2645_v27 = vpop.eup %2644 }
 0x678   : > { %1193 = vst.msk [vmem:[#allocation3] sm:$0xff] %vm617_vm0, %v1191_v49  ;;  %v2647_v34 = vpop.eup %2646 }
 0x679   : > { %1194 = vst.msk [vmem:[#allocation3 + $0x8] sm:$0xff] %vm617_vm0, %v1192_v50  ;;  %2518 = vmatprep.subr.bf16.mxu1 %v2517_v10  ;;  %v2649_v2 = vpop.eup %2648 }
 0x67a   : > { %2520 = vmatpush3.bf16.msra.mxu1 %v2517_v10  ;;  %v2651_v33 = vpop.eup %2650 }
 0x67b   : > { %2522 = vmatprep.subr.bf16.mxu1 %v2521_v51 }
 0x67d   : > { %v1424_v20 = vpop.permute.xlu1 %1423 }
 0x67e   : > { %1429 = vst.msk [vmem:[#allocation3 + $0x8] sm:$0xff] %vm1427_vm2, %v1424_v20  ;;  %v1422_v52 = vpop.permute.xlu0 %1421  ;;  %2524 = vmatpush3.bf16.msra.mxu1 %v2521_v51 }
 0x67f   : > { %1428 = vst.msk [vmem:[#allocation3] sm:$0xff] %vm1427_vm2, %v1422_v52  ;;  %2526 = vmatprep.subr.bf16.mxu1 %v2525_v59 }
 0x682   : > { %2528 = vmatpush3.bf16.msra.mxu1 %v2525_v59 }
 0x683   : > { %v2413_v31 = vpop.f32.mrb[6].mxu1  ;;  %2530 = vmatprep.subr.bf16.mxu1 %v2529_v1 }
 0x684   : > { %v1653_v38 = vmul.f32 %v2645_v27, %v2413_v31  ;;  %v1643_v55 = vpop.f32.mrb[7].mxu1 }
 0x685   : > { %v1652_v56 = vmul.f32 %v2647_v34, %v1643_v55 }
 0x686   : > { %1658 = vrot.lane.b32.xlu0 %v1653_v38, %s2777_s7  ;;  %2532 = vmatpush3.bf16.msra.mxu1 %v2529_v1 }
 0x687   : > { %1656 = vrot.lane.b32.xlu1 %v1652_v56, %s2777_s7 }
 0x6b8   : > { %v2427_v35 = vpop.f32.mrb[24].mxu0 }
 0x6b9   : > { %v1888_v6 = vmul.f32 %v2649_v2, %v2427_v35  ;;  %v1878_v7 = vpop.f32.mrb[25].mxu0 }
 0x6ba   : > { %v1887_v8 = vmul.f32 %v2651_v33, %v1878_v7 }
 0x6bb   : > { %1893 = vrot.lane.b32.xlu0 %v1888_v6, %s2778_s25 }
 0x6bc   : > { %1891 = vrot.lane.b32.xlu1 %v1887_v8, %s2778_s25  ;;  %s2686_s25 = sshll.u32 %s2779_s15, 4  ;;  %s2687_s25 = int_to_ptr.vmem [resolvable:$false] %s2686_s25 }
 0x6bd   : > { %s2688_s12 = scalar_lea.vmem %s2687_s25, 512  ;;  %p2689_p1 = scmp.lt.s32.totalorder %s3354_s0, %s2687_s25 }
 0x6be   : > { %p2690_p6 = scmp.lt.s32.totalorder %s2688_s12, %s2682_s20 }
 0x6c0   : > { %p2691_p7 = por %p2690_p6, %p2689_p1 }
 0x6c2   : > { %p2692_p9 = pnand %p2691_p7, %p2685_p13 }
 0x6f8   : > { %v1659_v9 = vpop.permute.xlu0 %1658 }
 0x6f9   : > { %1664 = vst.msk [vmem:[#allocation3 + $0x8] sm:$0xff] %vm1662_vm3, %v1659_v9  ;;  %v1657_v14 = vpop.permute.xlu1 %1656 }
 0x6fa   : > { %1663 = vst.msk [vmem:[#allocation3] sm:$0xff] %vm1662_vm3, %v1657_v14 }
 0x72d   : > { %v1894_v42 = vpop.permute.xlu0 %1893 }
 0x72e   : > { %1899 = vst.msk [vmem:[#allocation3 + $0x8] sm:$0xff] %vm1897_vm4, %v1894_v42  ;;  %v1892_v43 = vpop.permute.xlu1 %1891 }
 0x72f   : > { %1898 = vst.msk [vmem:[#allocation3] sm:$0xff] %vm1897_vm4, %v1892_v43 }
 0x735   : > { %v1901_v18 = vld [vmem:[#allocation3 + $0x8] sm:$0xff] }
 0x736   : > { %v1900_v15 = vld [vmem:[#allocation3] sm:$0xff] }
 0x737   : > { %2444 = vmatprep.mubr.msk.f32.mxu1 %vm1917_vm5, %v1900_v15 }
 0x738   : > { %2445 = vmatmul.mubr.msk.f32.vlgmr.msra.gmra.mrb[8].mxu1 %vm1917_vm5, %v1901_v18 }
 0x80b   : > { %v2446_v23 = vpop.f32.mrb[8].mxu1 }
 0x80c   : > { %v1996_v25 = vadd.f32 %v2446_v23, %v2243_v22  ;;  %v1990_v54 = vpop.f32.mrb[9].mxu1 }
 0x80d   : > { %v1991_v61 = vadd.f32 %v2243_v22, %v1990_v54 }
 0x80e   : > { %2000 = vst.msk [vmem:[%s472_s16 + $0x8] sm:$0xff] %vm1917_vm5, %v1996_v25 }
 0x80f   : > { %1999 = vst.msk [vmem:[%s472_s16] sm:$0xff] %vm1917_vm5, %v1991_v61 }
 0x810   : > { %2695 = shalt.err (!%p2692_p9)
}
 0x811   : > { %s2696_s24 = scalar_lea.hbm %s3359_s13, 256  ;;  %s2700_s16 = scalar_lea.hbm %s3420_s11, 512 }
 0x812   : > { %p2697_p12 = scmp.ne.s32.totalorder %s3359_s13, %s2696_s24  ;;  %p2701_p3 = scmp.lt.u32.totalorder %s3359_s13, %s3420_s11 }
 0x813   : > { %p2702_p5 = scmp.lt.u32.totalorder %s2700_s16, %s2696_s24  ;;  %p2704_p8 = scmp.lt.u32.totalorder %s2696_s24, %s3359_s13 }
 0x814   : > { %p2698_p0 = pnand %p2697_p12, %p3444_p10 }
 0x815   : > { %p2703_p4 = por %p2702_p5, %p2701_p3 }
 0x816   : > { %p2699_p2 = pneg %p2698_p0 }
 0x817   : > { %p2705_p11 = por %p2704_p8, %p2703_p4 }
 0x819   : > { %p2706_p13 = pnand %p2705_p11, %p2699_p2 }
 0x81b   : > { %2709 = shalt.err (!%p2706_p13)
}
 0x81c   : > { %s2780_s23 = smov 128   ;;  %s2781_s20 = smov 8  }
 0x81d   : > { %2541 = dma.vmem_to_hbm [thread:$0]  (%p3444_p10), %s3354_s0, 256, %s3359_s13, %s3363_s14, %s2780_s23, %s2780_s23, %s2781_s20  }
 0x81e PF: > { %p2558_p1 = scmp.ge.s32.totalorder %s2768_s22, 2  ;;  %s2032_s15 = sand.u32 1, %s2748_s17  }
 0x81f   : > { %p3445_p6 = scmp.ne.s32.totalorder %s3432_s29, 0  ;;  %s2033_s25 = scalar_lea.sflag [#allocation5], %s2032_s15 }
 0x821   : > { %p2551_p7 = pnand %p2558_p1, %p3445_p6 }
 0x823   : > { %2743 = dma.done.wait (!%p2551_p7), %s2033_s25, 256  }
 0x824   : > { %2745 = vsyncadd (!%p2551_p7), %s2033_s25, 4294967040  ;;  %s26_s22 = sadd.s32 1, %s2768_s22   ;;  %s3446_s27 = sld [smem:[#allocation13_spill]] }
 0x825   : > { %p23_p9 = scmp.ge.s32.totalorder %s26_s22, 4   ;;  %s3447_s17 = smov %s2752_s18 }
 0x826   : > { %s3448_s18 = smov %s2756_s19  ;;  %s3449_s19 = smov %s2895_s30 }
 0x827   : > { %s3450_s20 = smov %s2764_s21  ;;  %25 = sbr.rel (!%p23_p9) target bundleno = 10 (0xa), region = 122 }
 0x82a   : > { %s3451_s21 = smov %s3446_s27 }
 0x82e   :  { %2038 = vsyncpa [#allocation5], 1 }
 0x82f   :  { %2040 = vsyncpa [#allocation5 + $0x1], 1 }
 0x830   :  { %2041 = vsyncpa [#allocation6], 1 }
 0x831   :  { %2043 = vsyncpa [#allocation6 + $0x1], 1 }
 0x832   :  { %2044 = vsyncpa [#allocation8], 1 }

</bundles_post_ra>
